<compile_context>
chip_gen: v5e
topology: v5e:2x2
jax: 0.10.0
libtpu: 0.0.40
codegen_flags: <defaults>
</compile_context>

<pallas_src>
import jax
import jax.numpy as jnp
from jax.experimental import pallas as pl
from jax.experimental.pallas import tpu as pltpu

H1, H2 = 400, 300        # hidden widths from the PyTorch module
H1P, H2P = 512, 384      # padded to 128-lane multiples (zero-padded weights)


def _double_critic_kernel(sa_ref, w1_ref, b1_ref, w2_ref, b2_ref,
                          w3_ref, b3_ref, q_ref):
    """One grid step = one batch tile; both Q-heads computed in-kernel."""
    sa = sa_ref[...]                                   # [TB, S+A] bf16
    for h in range(2):                                 # unrolled over the 2 heads
        # Layer 1: [TB, S+A] @ [S+A, 512] -> f32 accumulate
        h1 = jnp.dot(sa, w1_ref[h], preferred_element_type=jnp.float32) + b1_ref[h]
        h1 = jnp.maximum(h1, 0.0).astype(jnp.bfloat16)
        # Layer 2: [TB, 512] @ [512, 384]
        h2 = jnp.dot(h1, w2_ref[h], preferred_element_type=jnp.float32) + b2_ref[h]
        h2 = jnp.maximum(h2, 0.0).astype(jnp.bfloat16)
        # Output layer (N=1): VPU multiply + lane reduction instead of an
        # almost-empty MXU pass.  w3 is stored as a [1, H2P] row.
        q = jnp.sum(h2.astype(jnp.float32) * w3_ref[h].astype(jnp.float32),
                    axis=-1, keepdims=True) + b3_ref[h]
        q_ref[:, h:h + 1] = q                          # column h of [TB, 2] slab


def double_critic_forward(state, action, params, *, batch_tile=256):
    """Pallas forward. Returns (q1, q2), each [B, 1] float32."""
    B, S = state.shape
    A = action.shape[1]
    SA = S + A

    sa = jnp.concatenate([state, action], axis=1).astype(jnp.bfloat16)

    if B <= batch_tile:
        TB, Bp = B, B                      # single tile, block == full array
    else:
        TB = batch_tile                    # multiple of 8 -> valid sublane tile
        Bp = -(-B // TB) * TB
        if Bp != B:
            sa = jnp.pad(sa, ((0, Bp - B), (0, 0)))
    grid = (Bp // TB,)

    weight_map = lambda i: (0, 0, 0)       # same block every step -> resident

    flops = 2 * 2 * (Bp * SA * H1P + Bp * H1P * H2P + Bp * H2P)
    bytes_accessed = (
        2 * (SA * H1P + H1P * H2P + H2P) * 2      # bf16 weights
        + 2 * (H1P + H2P + 1) * 4                 # f32 biases
        + Bp * SA * 2 + Bp * 2 * 4                # sa in, q out
    )

    q = pl.pallas_call(
        _double_critic_kernel,
        out_shape=jax.ShapeDtypeStruct((Bp, 2), jnp.float32),
        grid=grid,
        in_specs=[
            pl.BlockSpec((TB, SA), lambda i: (i, 0)),        # sa batch tile
            pl.BlockSpec((2, SA, H1P), weight_map),          # w1 (both heads)
            pl.BlockSpec((2, 1, H1P), weight_map),           # b1
            pl.BlockSpec((2, H1P, H2P), weight_map),         # w2
            pl.BlockSpec((2, 1, H2P), weight_map),           # b2
            pl.BlockSpec((2, 1, H2P), weight_map),           # w3 (row vector)
            pl.BlockSpec((2, 1, 1), weight_map),             # b3
        ],
        out_specs=pl.BlockSpec((TB, 2), lambda i: (i, 0)),
        compiler_params=pltpu.CompilerParams(
            dimension_semantics=("parallel",),   # batch tiles -> 2 TCs on v7x
        ),
        cost_estimate=pl.CostEstimate(
            flops=flops, transcendentals=0, bytes_accessed=bytes_accessed),
    )(sa, params["w1"], params["b1"], params["w2"], params["b2"],
      params["w3"], params["b3"])

    q = q[:B]
    return q[:, 0:1], q[:, 1:2]


def init_params(key, state_dim, action_dim):
    """nn.Linear-style init (U(-1/sqrt(fan_in), ...)) for both heads.

    Returns (kernel_params, fp32_reference_params).  Kernel params are zero-
    padded to lane-aligned widths and stored bf16 (weights) / f32 (biases);
    reference params are the unpadded fp32 PyTorch-equivalent tensors.
    """
    dims = [(state_dim + action_dim, H1), (H1, H2), (H2, 1)]
    heads = []
    for _ in range(2):
        layers = []
        for fan_in, fan_out in dims:
            key, kw, kb = jax.random.split(key, 3)
            bound = 1.0 / (fan_in ** 0.5)
            w = jax.random.uniform(kw, (fan_in, fan_out), jnp.float32, -bound, bound)
            b = jax.random.uniform(kb, (fan_out,), jnp.float32, -bound, bound)
            layers.append((w, b))
        heads.append(layers)

    def stack(idx, fn):
        return jnp.stack([fn(heads[h][idx]) for h in range(2)])

    params = {
        "w1": stack(0, lambda l: jnp.pad(l[0], ((0, 0), (0, H1P - H1)))).astype(jnp.bfloat16),
        "b1": stack(0, lambda l: jnp.pad(l[1], (0, H1P - H1))[None, :]),          # [2,1,512] f32
        "w2": stack(1, lambda l: jnp.pad(l[0], ((0, H1P - H1), (0, H2P - H2)))).astype(jnp.bfloat16),
        "b2": stack(1, lambda l: jnp.pad(l[1], (0, H2P - H2))[None, :]),          # [2,1,384] f32
        "w3": stack(2, lambda l: jnp.pad(l[0].T, ((0, 0), (0, H2P - H2)))).astype(jnp.bfloat16),  # [2,1,384]
        "b3": stack(2, lambda l: l[1][None, :]),                                  # [2,1,1] f32
    }
    ref = {
        "w1": stack(0, lambda l: l[0]), "b1": stack(0, lambda l: l[1]),
        "w2": stack(1, lambda l: l[0]), "b2": stack(1, lambda l: l[1]),
        "w3": stack(2, lambda l: l[0]), "b3": stack(2, lambda l: l[1]),
    }
    return params, ref


def reference_forward_bf16(state, action, params):
    """Plain-JAX reference with the identical bf16/padded strategy (tight check)."""
    sa = jnp.concatenate([state, action], axis=1).astype(jnp.bfloat16)

    def head(i):
        h1 = jnp.dot(sa, params["w1"][i], preferred_element_type=jnp.float32) + params["b1"][i]
        h1 = jnp.maximum(h1, 0.0).astype(jnp.bfloat16)
        h2 = jnp.dot(h1, params["w2"][i], preferred_element_type=jnp.float32) + params["b2"][i]
        h2 = jnp.maximum(h2, 0.0).astype(jnp.bfloat16)
        return (jnp.sum(h2.astype(jnp.float32) * params["w3"][i].astype(jnp.float32),
                        axis=-1, keepdims=True) + params["b3"][i])

    return head(0), head(1)


def reference_forward_f32(state, action, ref):
    """True fp32 PyTorch-equivalent math (loose check; weights are bf16 in-kernel)."""
    sa = jnp.concatenate([state, action], axis=1)

    def head(i):
        h1 = jnp.maximum(sa @ ref["w1"][i] + ref["b1"][i], 0.0)
        h2 = jnp.maximum(h1 @ ref["w2"][i] + ref["b2"][i], 0.0)
        return h2 @ ref["w3"][i] + ref["b3"][i]

    return head(0), head(1)


if __name__ == "__main__":
    B, STATE_DIM, ACTION_DIM = 8, 16, 4

    key = jax.random.PRNGKey(0)
    kp, ks, ka = jax.random.split(key, 3)
    params, ref_params = init_params(kp, STATE_DIM, ACTION_DIM)
    state = jax.random.normal(ks, (B, STATE_DIM), jnp.float32)
    action = jax.random.normal(ka, (B, ACTION_DIM), jnp.float32)

    q1, q2 = double_critic_forward(state, action, params)
    jax.block_until_ready((q1, q2))
    assert q1.shape == (B, 1) and q2.shape == (B, 1)

    # Tight check: identical dtype/padding strategy in plain JAX.
    q1_b, q2_b = reference_forward_bf16(state, action, params)
    assert jnp.allclose(q1, q1_b, atol=1e-3, rtol=1e-3)
    assert jnp.allclose(q2, q2_b, atol=1e-3, rtol=1e-3)

    # Loose check: true fp32 DoubleCritic math (documents bf16-weight error).
    q1_f, q2_f = reference_forward_f32(state, action, ref_params)
    assert jnp.allclose(q1, q1_f, atol=5e-2, rtol=5e-2)
    assert jnp.allclose(q2, q2_f, atol=5e-2, rtol=5e-2)

    print("KERNEL_OK")
</pallas_src>

<mosaic_0001>
module attributes {stable_mosaic.version = 11 : i64} {
  func.func @_double_critic_kernel(%arg0: i32, %arg1: memref<8x20xbf16, #tpu.memory_space<vmem>>, %arg2: memref<2x20x512xbf16, #tpu.memory_space<vmem>>, %arg3: memref<2x1x512xf32, #tpu.memory_space<vmem>>, %arg4: memref<2x512x384xbf16, #tpu.memory_space<vmem>>, %arg5: memref<2x1x384xf32, #tpu.memory_space<vmem>>, %arg6: memref<2x1x384xbf16, #tpu.memory_space<vmem>>, %arg7: memref<2x1x1xf32, #tpu.memory_space<vmem>>, %arg8: memref<8x2xf32, #tpu.memory_space<vmem>>) attributes {dimension_semantics = [#tpu.dimension_semantics<parallel>], iteration_bounds = array<i64: 1>, scalar_prefetch = 0 : i64, scratch_operands = 0 : i64, tpu.core_type = #tpu.core_type<tc>, window_params = [{transform_indices = @transform_0, window_bounds = array<i64: 8, 20>}, {pipeline_mode = #tpu.pipeline_mode<synchronous>, transform_indices = @transform_1, window_bounds = array<i64: 2, 20, 512>}, {pipeline_mode = #tpu.pipeline_mode<synchronous>, transform_indices = @transform_2, window_bounds = array<i64: 2, 1, 512>}, {pipeline_mode = #tpu.pipeline_mode<synchronous>, transform_indices = @transform_3, window_bounds = array<i64: 2, 512, 384>}, {pipeline_mode = #tpu.pipeline_mode<synchronous>, transform_indices = @transform_4, window_bounds = array<i64: 2, 1, 384>}, {pipeline_mode = #tpu.pipeline_mode<synchronous>, transform_indices = @transform_5, window_bounds = array<i64: 2, 1, 384>}, {pipeline_mode = #tpu.pipeline_mode<synchronous>, transform_indices = @transform_6, window_bounds = array<i64: 2, 1, 1>}, {transform_indices = @transform_7, window_bounds = array<i64: 8, 2>}]} {
    %c0 = arith.constant 0 : index
    %c0_0 = arith.constant 0 : index
    %0 = vector.load %arg1[%c0, %c0_0] : memref<8x20xbf16, #tpu.memory_space<vmem>>, vector<8x20xbf16>
    %c0_1 = arith.constant 0 : index
    %c0_2 = arith.constant 0 : index
    %c0_3 = arith.constant 0 : index
    %1 = vector.load %arg2[%c0_1, %c0_2, %c0_3] : memref<2x20x512xbf16, #tpu.memory_space<vmem>>, vector<1x20x512xbf16>
    %2 = vector.shape_cast %1 : vector<1x20x512xbf16> to vector<20x512xbf16>
    %cst = arith.constant dense<0.000000e+00> : vector<8x512xf32>
    %3 = tpu.matmul %0, %2, %cst {dimension_numbers = #tpu.dot_dimension_numbers<[1], [0], [0], [1], [0, 0, 1, 1], [], []>} : vector<8x20xbf16>, vector<20x512xbf16>, vector<8x512xf32> -> vector<8x512xf32>
    %c0_4 = arith.constant 0 : index
    %c0_5 = arith.constant 0 : index
    %c0_6 = arith.constant 0 : index
    %4 = vector.load %arg3[%c0_4, %c0_5, %c0_6] : memref<2x1x512xf32, #tpu.memory_space<vmem>>, vector<1x1x512xf32>
    %5 = vector.shape_cast %4 : vector<1x1x512xf32> to vector<1x512xf32>
    %6 = vector.broadcast %5 : vector<1x512xf32> to vector<8x512xf32>
    %7 = arith.addf %3, %6 : vector<8x512xf32>
    %cst_7 = arith.constant 0.000000e+00 : f32
    %8 = vector.broadcast %cst_7 : f32 to vector<8x512xf32>
    %9 = arith.maximumf %7, %8 : vector<8x512xf32>
    %10 = arith.truncf %9 : vector<8x512xf32> to vector<8x512xbf16>
    %c0_8 = arith.constant 0 : index
    %c0_9 = arith.constant 0 : index
    %c0_10 = arith.constant 0 : index
    %11 = vector.load %arg4[%c0_8, %c0_9, %c0_10] : memref<2x512x384xbf16, #tpu.memory_space<vmem>>, vector<1x512x384xbf16>
    %12 = vector.shape_cast %11 : vector<1x512x384xbf16> to vector<512x384xbf16>
    %cst_11 = arith.constant dense<0.000000e+00> : vector<8x384xf32>
    %13 = tpu.matmul %10, %12, %cst_11 {dimension_numbers = #tpu.dot_dimension_numbers<[1], [0], [0], [1], [0, 0, 1, 1], [], []>} : vector<8x512xbf16>, vector<512x384xbf16>, vector<8x384xf32> -> vector<8x384xf32>
    %c0_12 = arith.constant 0 : index
    %c0_13 = arith.constant 0 : index
    %c0_14 = arith.constant 0 : index
    %14 = vector.load %arg5[%c0_12, %c0_13, %c0_14] : memref<2x1x384xf32, #tpu.memory_space<vmem>>, vector<1x1x384xf32>
    %15 = vector.shape_cast %14 : vector<1x1x384xf32> to vector<1x384xf32>
    %16 = vector.broadcast %15 : vector<1x384xf32> to vector<8x384xf32>
    %17 = arith.addf %13, %16 : vector<8x384xf32>
    %cst_15 = arith.constant 0.000000e+00 : f32
    %18 = vector.broadcast %cst_15 : f32 to vector<8x384xf32>
    %19 = arith.maximumf %17, %18 : vector<8x384xf32>
    %20 = arith.truncf %19 : vector<8x384xf32> to vector<8x384xbf16>
    %21 = arith.extf %20 : vector<8x384xbf16> to vector<8x384xf32>
    %c0_16 = arith.constant 0 : index
    %c0_17 = arith.constant 0 : index
    %c0_18 = arith.constant 0 : index
    %22 = vector.load %arg6[%c0_16, %c0_17, %c0_18] : memref<2x1x384xbf16, #tpu.memory_space<vmem>>, vector<1x1x384xbf16>
    %23 = vector.shape_cast %22 : vector<1x1x384xbf16> to vector<1x384xbf16>
    %24 = arith.extf %23 : vector<1x384xbf16> to vector<1x384xf32>
    %25 = vector.broadcast %24 : vector<1x384xf32> to vector<8x384xf32>
    %26 = arith.mulf %21, %25 : vector<8x384xf32>
    %cst_19 = arith.constant dense<0.000000e+00> : vector<8xf32>
    %27 = vector.multi_reduction <add>, %26, %cst_19 [1] : vector<8x384xf32> to vector<8xf32>
    %28 = vector.shape_cast %27 : vector<8xf32> to vector<8x1xf32>
    %c0_20 = arith.constant 0 : index
    %c0_21 = arith.constant 0 : index
    %c0_22 = arith.constant 0 : index
    %29 = vector.load %arg7[%c0_20, %c0_21, %c0_22] : memref<2x1x1xf32, #tpu.memory_space<vmem>>, vector<1x1x1xf32>
    %30 = vector.shape_cast %29 : vector<1x1x1xf32> to vector<1x1xf32>
    %31 = vector.broadcast %30 : vector<1x1xf32> to vector<8x1xf32>
    %32 = arith.addf %28, %31 : vector<8x1xf32>
    %c0_23 = arith.constant 0 : index
    %c0_24 = arith.constant 0 : index
    %33 = vector.load %arg8[%c0_23, %c0_24] : memref<8x2xf32, #tpu.memory_space<vmem>>, vector<8x1xf32>
    tpu.vector_store %arg8[%c0_23, %c0_24], %32 {strides = array<i32>} : memref<8x2xf32, #tpu.memory_space<vmem>>, vector<8x1xf32>,
    %c1 = arith.constant 1 : index
    %c0_25 = arith.constant 0 : index
    %c0_26 = arith.constant 0 : index
    %34 = vector.load %arg2[%c1, %c0_25, %c0_26] : memref<2x20x512xbf16, #tpu.memory_space<vmem>>, vector<1x20x512xbf16>
    %35 = vector.shape_cast %34 : vector<1x20x512xbf16> to vector<20x512xbf16>
    %cst_27 = arith.constant dense<0.000000e+00> : vector<8x512xf32>
    %36 = tpu.matmul %0, %35, %cst_27 {dimension_numbers = #tpu.dot_dimension_numbers<[1], [0], [0], [1], [0, 0, 1, 1], [], []>} : vector<8x20xbf16>, vector<20x512xbf16>, vector<8x512xf32> -> vector<8x512xf32>
    %c1_28 = arith.constant 1 : index
    %c0_29 = arith.constant 0 : index
    %c0_30 = arith.constant 0 : index
    %37 = vector.load %arg3[%c1_28, %c0_29, %c0_30] : memref<2x1x512xf32, #tpu.memory_space<vmem>>, vector<1x1x512xf32>
    %38 = vector.shape_cast %37 : vector<1x1x512xf32> to vector<1x512xf32>
    %39 = vector.broadcast %38 : vector<1x512xf32> to vector<8x512xf32>
    %40 = arith.addf %36, %39 : vector<8x512xf32>
    %cst_31 = arith.constant 0.000000e+00 : f32
    %41 = vector.broadcast %cst_31 : f32 to vector<8x512xf32>
    %42 = arith.maximumf %40, %41 : vector<8x512xf32>
    %43 = arith.truncf %42 : vector<8x512xf32> to vector<8x512xbf16>
    %c1_32 = arith.constant 1 : index
    %c0_33 = arith.constant 0 : index
    %c0_34 = arith.constant 0 : index
    %44 = vector.load %arg4[%c1_32, %c0_33, %c0_34] : memref<2x512x384xbf16, #tpu.memory_space<vmem>>, vector<1x512x384xbf16>
    %45 = vector.shape_cast %44 : vector<1x512x384xbf16> to vector<512x384xbf16>
    %cst_35 = arith.constant dense<0.000000e+00> : vector<8x384xf32>
    %46 = tpu.matmul %43, %45, %cst_35 {dimension_numbers = #tpu.dot_dimension_numbers<[1], [0], [0], [1], [0, 0, 1, 1], [], []>} : vector<8x512xbf16>, vector<512x384xbf16>, vector<8x384xf32> -> vector<8x384xf32>
    %c1_36 = arith.constant 1 : index
    %c0_37 = arith.constant 0 : index
    %c0_38 = arith.constant 0 : index
    %47 = vector.load %arg5[%c1_36, %c0_37, %c0_38] : memref<2x1x384xf32, #tpu.memory_space<vmem>>, vector<1x1x384xf32>
    %48 = vector.shape_cast %47 : vector<1x1x384xf32> to vector<1x384xf32>
    %49 = vector.broadcast %48 : vector<1x384xf32> to vector<8x384xf32>
    %50 = arith.addf %46, %49 : vector<8x384xf32>
    %cst_39 = arith.constant 0.000000e+00 : f32
    %51 = vector.broadcast %cst_39 : f32 to vector<8x384xf32>
    %52 = arith.maximumf %50, %51 : vector<8x384xf32>
    %53 = arith.truncf %52 : vector<8x384xf32> to vector<8x384xbf16>
    %54 = arith.extf %53 : vector<8x384xbf16> to vector<8x384xf32>
    %c1_40 = arith.constant 1 : index
    %c0_41 = arith.constant 0 : index
    %c0_42 = arith.constant 0 : index
    %55 = vector.load %arg6[%c1_40, %c0_41, %c0_42] : memref<2x1x384xbf16, #tpu.memory_space<vmem>>, vector<1x1x384xbf16>
    %56 = vector.shape_cast %55 : vector<1x1x384xbf16> to vector<1x384xbf16>
    %57 = arith.extf %56 : vector<1x384xbf16> to vector<1x384xf32>
    %58 = vector.broadcast %57 : vector<1x384xf32> to vector<8x384xf32>
    %59 = arith.mulf %54, %58 : vector<8x384xf32>
    %cst_43 = arith.constant dense<0.000000e+00> : vector<8xf32>
    %60 = vector.multi_reduction <add>, %59, %cst_43 [1] : vector<8x384xf32> to vector<8xf32>
    %61 = vector.shape_cast %60 : vector<8xf32> to vector<8x1xf32>
    %c1_44 = arith.constant 1 : index
    %c0_45 = arith.constant 0 : index
    %c0_46 = arith.constant 0 : index
    %62 = vector.load %arg7[%c1_44, %c0_45, %c0_46] : memref<2x1x1xf32, #tpu.memory_space<vmem>>, vector<1x1x1xf32>
    %63 = vector.shape_cast %62 : vector<1x1x1xf32> to vector<1x1xf32>
    %64 = vector.broadcast %63 : vector<1x1xf32> to vector<8x1xf32>
    %65 = arith.addf %61, %64 : vector<8x1xf32>
    %c0_47 = arith.constant 0 : index
    %c1_48 = arith.constant 1 : index
    %66 = vector.load %arg8[%c0_47, %c1_48] : memref<8x2xf32, #tpu.memory_space<vmem>>, vector<8x1xf32>
    tpu.vector_store %arg8[%c0_47, %c1_48], %65 {strides = array<i32>} : memref<8x2xf32, #tpu.memory_space<vmem>>, vector<8x1xf32>,
    return
  }
  func.func @transform_0(%arg0: i32) -> (i32, i32) {
    %c0_i32 = arith.constant 0 : i32
    %c0_i32_0 = arith.constant 0 : i32
    return %arg0, %c0_i32 : i32, i32
  }
  func.func @transform_1(%arg0: i32) -> (i32, i32, i32) {
    %c0_i32 = arith.constant 0 : i32
    %c0_i32_0 = arith.constant 0 : i32
    %c0_i32_1 = arith.constant 0 : i32
    %c0_i32_2 = arith.constant 0 : i32
    return %c0_i32, %c0_i32_0, %c0_i32_1 : i32, i32, i32
  }
  func.func @transform_2(%arg0: i32) -> (i32, i32, i32) {
    %c0_i32 = arith.constant 0 : i32
    %c0_i32_0 = arith.constant 0 : i32
    %c0_i32_1 = arith.constant 0 : i32
    %c0_i32_2 = arith.constant 0 : i32
    return %c0_i32, %c0_i32_0, %c0_i32_1 : i32, i32, i32
  }
  func.func @transform_3(%arg0: i32) -> (i32, i32, i32) {
    %c0_i32 = arith.constant 0 : i32
    %c0_i32_0 = arith.constant 0 : i32
    %c0_i32_1 = arith.constant 0 : i32
    %c0_i32_2 = arith.constant 0 : i32
    return %c0_i32, %c0_i32_0, %c0_i32_1 : i32, i32, i32
  }
  func.func @transform_4(%arg0: i32) -> (i32, i32, i32) {
    %c0_i32 = arith.constant 0 : i32
    %c0_i32_0 = arith.constant 0 : i32
    %c0_i32_1 = arith.constant 0 : i32
    %c0_i32_2 = arith.constant 0 : i32
    return %c0_i32, %c0_i32_0, %c0_i32_1 : i32, i32, i32
  }
  func.func @transform_5(%arg0: i32) -> (i32, i32, i32) {
    %c0_i32 = arith.constant 0 : i32
    %c0_i32_0 = arith.constant 0 : i32
    %c0_i32_1 = arith.constant 0 : i32
    %c0_i32_2 = arith.constant 0 : i32
    return %c0_i32, %c0_i32_0, %c0_i32_1 : i32, i32, i32
  }
  func.func @transform_6(%arg0: i32) -> (i32, i32, i32) {
    %c0_i32 = arith.constant 0 : i32
    %c0_i32_0 = arith.constant 0 : i32
    %c0_i32_1 = arith.constant 0 : i32
    %c0_i32_2 = arith.constant 0 : i32
    return %c0_i32, %c0_i32_0, %c0_i32_1 : i32, i32, i32
  }
  func.func @transform_7(%arg0: i32) -> (i32, i32) {
    %c0_i32 = arith.constant 0 : i32
    %c0_i32_0 = arith.constant 0 : i32
    return %arg0, %c0_i32 : i32, i32
  }
}

</mosaic_0001>

<bundles_post_ra>
// kernel: tpu_custom_call.1
= control target key start
LH: loop header
LB: loop body
LE: loop exit
PB: predicated region body
PF: predicated region fallthrough
CT: control target
= control target key end

     0   :  { %12 = vsyncpa [#allocation3], 0  ;;  %s3026_s27 = smov [#allocation2]   ;;  %s3027_s29 = smov 192   ;;  %s3249_s0 = inlined_call_operand.vmem [shape: bf16[8,20], index: 0, kind: input, shape index: {}]   ;;  %s3250_s1 = inlined_call_operand.vmem [shape: bf16[2,20,512], index: 1, kind: input, shape index: {}]   ;;  %s3251_s2 = inlined_call_operand.vmem [shape: f32[2,1,512], index: 2, kind: input, shape index: {}]   ;;  %s3252_s3 = inlined_call_operand.hbm [shape: bf16[2,512,384], index: 3, kind: input, shape index: {}]   ;;  %s3253_s4 = inlined_call_operand.vmem [shape: f32[2,1,384], index: 4, kind: input, shape index: {}]   ;;  %s3254_s5 = inlined_call_operand.vmem [shape: bf16[2,1,384], index: 5, kind: input, shape index: {}]   ;;  %s3255_s6 = inlined_call_operand.vmem [shape: f32[2,1,1], index: 6, kind: input, shape index: {}]   ;;  %s3256_s7 = inlined_call_operand.vmem [shape: f32[8,2], index: 7, kind: output, shape index: {}]  }
   0x1   :  { %s23_s26 = sshll.u32 %s3252_s3, 4  ;;  %s25_s28 = sshll.u32 %s3026_s27, 4  ;;  %s24_s26 = int_to_ptr.hbm [resolvable:$true] %s23_s26  ;;  %s26_s28 = int_to_ptr.vmem [resolvable:$true] %s25_s28 }
   0x2   :  { %s3028_s30 = smov 12  }
   0x3   :  { %31 = dma.hbm_to_vmem [thread:$0]  %s24_s26, 24576, %s26_s28, [#allocation3], %s3027_s29, %s3027_s29, %s3028_s30  }
   0x4   :  { %3024 = dma.done.wait [#allocation3], 24576  }
   0x5   :  { %3025 = vsyncadd [#allocation3], 4294942720  ;;  %v48_v0 = vld [vmem:[%s3250_s1 + $0x20] sm:$0x33]  ;;  %vm94_vm0 = vcmask 1041408   ;;  %vm90_vm1 = vcmask 162816  }
   0x6   :  { %v49_v1 = vld [vmem:[%s3250_s1 + $0x28] sm:$0x33]  ;;  %v74_v2 = vunpack.c.l.b16 %v48_v0  ;;  %v75_v3 = vunpack.c.h.b16 %v48_v0  ;;  %v1978_v6 = vld [vmem:[%s3250_s1] sm:$0xf]  ;;  %v2796_v7 = vld [vmem:[%s3250_s1 + $0xc] sm:$0xf0] }
   0x7   :  { %v76_v4 = vunpack.c.l.b16 %v49_v1  ;;  %v77_v5 = vunpack.c.h.b16 %v49_v1  ;;  %v2794_v8 = vld [vmem:[%s3250_s1 + $0x4] sm:$0xf]  ;;  %v1980_v9 = vld [vmem:[%s3250_s1 + $0x10] sm:$0xf0]  ;;  %v1986_v10 = vld [vmem:[%s3250_s1 + $0x8] sm:$0xf]  ;;  %v1979_v26 = vor.u32 %v2796_v7, %v1978_v6 }
   0x8   :  { %v82_v11 = vpack.c.b16 %v74_v2, %v74_v2  ;;  %v83_v12 = vpack.c.b16 %v75_v3, %v75_v3  ;;  %v2797_v15 = vld [vmem:[%s3250_s1 + $0x14] sm:$0xf0]  ;;  %v2795_v16 = vld [vmem:[%s3250_s1 + $0xc] sm:$0xf]  ;;  %v1988_v17 = vld [vmem:[%s3250_s1 + $0x18] sm:$0xf0]  ;;  %v1983_v27 = vor.u32 %v2794_v8, %v1980_v9 }
   0x9   :  { %v84_v13 = vpack.c.b16 %v76_v4, %v76_v4  ;;  %v85_v14 = vpack.c.b16 %v77_v5, %v77_v5  ;;  %v2082_v18 = vld [vmem:[#allocation2 + $0xa8] sm:$0xf]  ;;  %v2820_v19 = vld [vmem:[#allocation2 + $0xb0] sm:$0xf0]  ;;  %v1987_v28 = vor.u32 %v2797_v15, %v1986_v10  ;;  %v1991_v29 = vor.u32 %v2795_v16, %v1988_v17  ;;  %v2070_v30 = vld [vmem:[#allocation2 + $0x90] sm:$0xf] }
   0xa   :  { %v2178_v20 = vld [vmem:[#allocation2 + $0x168] sm:$0xf]  ;;  %v96_v21 = vsel %vm94_vm0, %v82_v11, 0  ;;  %v99_v22 = vsel %vm94_vm0, %v83_v12, 0  ;;  %v2844_v25 = vld [vmem:[#allocation2 + $0x170] sm:$0xf0]  ;;  %v2083_v32 = vor.u32 %v2820_v19, %v2082_v18 }
   0xb   :  { %v102_v23 = vsel %vm94_vm0, %v84_v13, 0  ;;  %v105_v24 = vsel %vm94_vm0, %v85_v14, 0  ;;  %113 = vmatpush.bf16.msra.mxu0 %v96_v21  ;;  %126 = vmatpush.bf16.msra.mxu1 %v99_v22  ;;  %v2274_v31 = vld [vmem:[#allocation2 + $0x228] sm:$0xf]  ;;  %v2179_v33 = vor.u32 %v2844_v25, %v2178_v20  ;;  %v2868_v34 = vld [vmem:[#allocation2 + $0x230] sm:$0xf0] }
   0xc   :  { %139 = vmatpush.bf16.msra.mxu2 %v102_v23  ;;  %152 = vmatpush.bf16.msra.mxu3 %v105_v24  ;;  %v2370_v35 = vld [vmem:[#allocation2 + $0x2e8] sm:$0xf]  ;;  %v2892_v36 = vld [vmem:[#allocation2 + $0x2f0] sm:$0xf0]  ;;  %v2817_v37 = vld [vmem:[#allocation2 + $0x98] sm:$0xf0]  ;;  %v2275_v41 = vor.u32 %v2868_v34, %v2274_v31 }
   0xd   :  { %v2166_v38 = vld [vmem:[#allocation2 + $0x150] sm:$0xf]  ;;  %v2841_v39 = vld [vmem:[#allocation2 + $0x158] sm:$0xf0]  ;;  %v3110_v40 = vld [vmem:[%s3249_s0] sm:$0xf]  ;;  %v2371_v42 = vor.u32 %v2892_v36, %v2370_v35  ;;  %v2071_v45 = vor.u32 %v2817_v37, %v2070_v30 }
   0xe   :  { %v2058_v43 = vld [vmem:[#allocation2 + $0x78] sm:$0xf]  ;;  %v2262_v44 = vld [vmem:[#allocation2 + $0x210] sm:$0xf]  ;;  %v2167_v46 = vor.u32 %v2841_v39, %v2166_v38  ;;  %v2865_v47 = vld [vmem:[#allocation2 + $0x218] sm:$0xf0] }
   0xf   :  { %114 = vmatpush.bf16.msra.mxu0 %v1979_v26  ;;  %127 = vmatpush.bf16.msra.mxu1 %v1983_v27  ;;  %v2358_v48 = vld [vmem:[#allocation2 + $0x2d0] sm:$0xf]  ;;  %v2889_v49 = vld [vmem:[#allocation2 + $0x2d8] sm:$0xf0]  ;;  %v2814_v50 = vld [vmem:[#allocation2 + $0x80] sm:$0xf0]  ;;  %v2263_v53 = vor.u32 %v2865_v47, %v2262_v44 }
  0x10   :  { %140 = vmatpush.bf16.msra.mxu2 %v1987_v28  ;;  %153 = vmatpush.bf16.msra.mxu3 %v1991_v29  ;;  %v2154_v51 = vld [vmem:[#allocation2 + $0x138] sm:$0xf]  ;;  %v2838_v52 = vld [vmem:[#allocation2 + $0x140] sm:$0xf0]  ;;  %v2359_v54 = vor.u32 %v2889_v49, %v2358_v48  ;;  %v2046_v55 = vld [vmem:[#allocation2 + $0x60] sm:$0xf]  ;;  %v2059_v57 = vor.u32 %v2814_v50, %v2058_v43 }
  0x11   :  { %v2250_v56 = vld [vmem:[#allocation2 + $0x1f8] sm:$0xf]  ;;  %v2155_v58 = vor.u32 %v2838_v52, %v2154_v51  ;;  %v2862_v59 = vld [vmem:[#allocation2 + $0x200] sm:$0xf0]  ;;  %v2811_v62 = vld [vmem:[#allocation2 + $0x68] sm:$0xf0] }
  0x12   :  { %1992 = vmatmul.msk.bf16.vlgmr.msra.gmra.mxu0 %vm90_vm1, %v3110_v40  ;;  %1993 = vmatmul.msk.bf16.vlgmr.msra.gmra.mxu1 %vm90_vm1, %v3110_v40  ;;  %v2346_v60 = vld [vmem:[#allocation2 + $0x2b8] sm:$0xf]  ;;  %v2886_v61 = vld [vmem:[#allocation2 + $0x2c0] sm:$0xf0]  ;;  %v2142_v63 = vld [vmem:[#allocation2 + $0x120] sm:$0xf]  ;;  %v2251_v1 = vor.u32 %v2862_v59, %v2250_v56  ;;  %v2047_v5 = vor.u32 %v2811_v62, %v2046_v55 }
  0x13   :  { %815 = vmatpush.bf16.msrb.mxu0 %v2083_v32  ;;  %828 = vmatpush.bf16.msrb.mxu1 %v2179_v33  ;;  %v2835_v0 = vld [vmem:[#allocation2 + $0x128] sm:$0xf0]  ;;  %v2347_v2 = vor.u32 %v2886_v61, %v2346_v60  ;;  %v2034_v3 = vld [vmem:[#allocation2 + $0x48] sm:$0xf]  ;;  %v2238_v4 = vld [vmem:[#allocation2 + $0x1e0] sm:$0xf] }
  0x14   :  { %1994 = vmatmul.msk.bf16.vlgmr.msra.gmra.mxu2 %vm90_vm1, %v3110_v40  ;;  %1995 = vmatmul.msk.bf16.vlgmr.msra.gmra.mxu3 %vm90_vm1, %v3110_v40  ;;  %v2143_v6 = vor.u32 %v2835_v0, %v2142_v63  ;;  %v2859_v7 = vld [vmem:[#allocation2 + $0x1e8] sm:$0xf0]  ;;  %v2334_v8 = vld [vmem:[#allocation2 + $0x2a0] sm:$0xf]  ;;  %v2808_v10 = vld [vmem:[#allocation2 + $0x50] sm:$0xf0] }
  0x15   :  { %841 = vmatpush.bf16.msrb.mxu2 %v2275_v41  ;;  %854 = vmatpush.bf16.msrb.mxu3 %v2371_v42  ;;  %v2883_v9 = vld [vmem:[#allocation2 + $0x2a8] sm:$0xf0]  ;;  %v2130_v11 = vld [vmem:[#allocation2 + $0x108] sm:$0xf]  ;;  %v2832_v12 = vld [vmem:[#allocation2 + $0x110] sm:$0xf0]  ;;  %v2239_v13 = vor.u32 %v2859_v7, %v2238_v4  ;;  %v2035_v17 = vor.u32 %v2808_v10, %v2034_v3 }
  0x16   :  { %v2335_v14 = vor.u32 %v2883_v9, %v2334_v8  ;;  %v2022_v15 = vld [vmem:[#allocation2 + $0x30] sm:$0xf]  ;;  %v2226_v16 = vld [vmem:[#allocation2 + $0x1c8] sm:$0xf]  ;;  %v2131_v18 = vor.u32 %v2832_v12, %v2130_v11  ;;  %v2856_v19 = vld [vmem:[#allocation2 + $0x1d0] sm:$0xf0] }
  0x17   :  { %816 = vmatpush.bf16.msrb.mxu0 %v2071_v45  ;;  %829 = vmatpush.bf16.msrb.mxu1 %v2167_v46  ;;  %v2322_v20 = vld [vmem:[#allocation2 + $0x288] sm:$0xf]  ;;  %v2880_v21 = vld [vmem:[#allocation2 + $0x290] sm:$0xf0]  ;;  %v2805_v22 = vld [vmem:[#allocation2 + $0x38] sm:$0xf0]  ;;  %v2227_v25 = vor.u32 %v2856_v19, %v2226_v16 }
  0x18   :  { %v2118_v23 = vld [vmem:[#allocation2 + $0xf0] sm:$0xf]  ;;  %v2829_v24 = vld [vmem:[#allocation2 + $0xf8] sm:$0xf0]  ;;  %v2323_v26 = vor.u32 %v2880_v21, %v2322_v20  ;;  %v2010_v27 = vld [vmem:[#allocation2 + $0x18] sm:$0xf]  ;;  %v2023_v29 = vor.u32 %v2805_v22, %v2022_v15 }
  0x19   :  { %842 = vmatpush.bf16.msrb.mxu2 %v2263_v53  ;;  %855 = vmatpush.bf16.msrb.mxu3 %v2359_v54  ;;  %v2214_v28 = vld [vmem:[#allocation2 + $0x1b0] sm:$0xf]  ;;  %v2119_v30 = vor.u32 %v2829_v24, %v2118_v23  ;;  %v2853_v31 = vld [vmem:[#allocation2 + $0x1b8] sm:$0xf0]  ;;  %v2802_v34 = vld [vmem:[#allocation2 + $0x20] sm:$0xf0] }
  0x1a   :  { %v2310_v32 = vld [vmem:[#allocation2 + $0x270] sm:$0xf]  ;;  %v2877_v33 = vld [vmem:[#allocation2 + $0x278] sm:$0xf0]  ;;  %v2106_v35 = vld [vmem:[#allocation2 + $0xd8] sm:$0xf]  ;;  %v2215_v37 = vor.u32 %v2853_v31, %v2214_v28  ;;  %v2011_v43 = vor.u32 %v2802_v34, %v2010_v27 }
  0x1b   :  { %817 = vmatpush.bf16.msrb.mxu0 %v2059_v57  ;;  %830 = vmatpush.bf16.msrb.mxu1 %v2155_v58  ;;  %v2826_v36 = vld [vmem:[#allocation2 + $0xe0] sm:$0xf0]  ;;  %v2311_v38 = vor.u32 %v2877_v33, %v2310_v32  ;;  %v1998_v39 = vld [vmem:[#allocation2] sm:$0xf]  ;;  %v2799_v41 = vld [vmem:[#allocation2 + $0x8] sm:$0xf0] }
  0x1c   :  { %v2202_v42 = vld [vmem:[#allocation2 + $0x198] sm:$0xf]  ;;  %v2107_v44 = vor.u32 %v2826_v36, %v2106_v35  ;;  %v2850_v45 = vld [vmem:[#allocation2 + $0x1a0] sm:$0xf0]  ;;  %v2094_v48 = vld [vmem:[#allocation2 + $0xc0] sm:$0xf]  ;;  %v1999_v58 = vor.u32 %v2799_v41, %v1998_v39 }
  0x1d   :  { %843 = vmatpush.bf16.msrb.mxu2 %v2251_v1  ;;  %856 = vmatpush.bf16.msrb.mxu3 %v2347_v2  ;;  %v2298_v46 = vld [vmem:[#allocation2 + $0x258] sm:$0xf]  ;;  %v2874_v47 = vld [vmem:[#allocation2 + $0x260] sm:$0xf0]  ;;  %v2823_v49 = vld [vmem:[#allocation2 + $0xc8] sm:$0xf0]  ;;  %v2203_v54 = vor.u32 %v2850_v45, %v2202_v42 }
  0x1e   :  { %v2819_v50 = vld [vmem:[#allocation2 + $0xac] sm:$0xf]  ;;  %v2084_v51 = vld [vmem:[#allocation2 + $0xb4] sm:$0xf0]  ;;  %v2299_v55 = vor.u32 %v2874_v47, %v2298_v46  ;;  %v2190_v56 = vld [vmem:[#allocation2 + $0x180] sm:$0xf]  ;;  %v2095_v59 = vor.u32 %v2823_v49, %v2094_v48 }
  0x1f   :  { %818 = vmatpush.bf16.msrb.mxu0 %v2047_v5  ;;  %831 = vmatpush.bf16.msrb.mxu1 %v2143_v6  ;;  %v2843_v52 = vld [vmem:[#allocation2 + $0x16c] sm:$0xf]  ;;  %v2180_v53 = vld [vmem:[#allocation2 + $0x174] sm:$0xf0]  ;;  %v2816_v60 = vld [vmem:[#allocation2 + $0x94] sm:$0xf]  ;;  %v2087_v0 = vor.u32 %v2819_v50, %v2084_v51 }
  0x20   :  { %v2847_v57 = vld [vmem:[#allocation2 + $0x188] sm:$0xf0]  ;;  %v2286_v61 = vld [vmem:[#allocation2 + $0x240] sm:$0xf]  ;;  %v2183_v1 = vor.u32 %v2843_v52, %v2180_v53  ;;  %v2276_v2 = vld [vmem:[#allocation2 + $0x234] sm:$0xf0] }
  0x21   :  { %844 = vmatpush.bf16.msrb.mxu2 %v2239_v13  ;;  %857 = vmatpush.bf16.msrb.mxu3 %v2335_v14  ;;  %v2871_v62 = vld [vmem:[#allocation2 + $0x248] sm:$0xf0]  ;;  %v2372_v4 = vld [vmem:[#allocation2 + $0x2f4] sm:$0xf0]  ;;  %v2072_v5 = vld [vmem:[#allocation2 + $0x9c] sm:$0xf0]  ;;  %v2191_v8 = vor.u32 %v2847_v57, %v2190_v56 }
  0x22   :  { %v2867_v63 = vld [vmem:[#allocation2 + $0x22c] sm:$0xf]  ;;  %v2840_v6 = vld [vmem:[#allocation2 + $0x154] sm:$0xf]  ;;  %v2168_v7 = vld [vmem:[#allocation2 + $0x15c] sm:$0xf0]  ;;  %v2287_v9 = vor.u32 %v2871_v62, %v2286_v61  ;;  %v2075_v14 = vor.u32 %v2816_v60, %v2072_v5 }
  0x23   :  { %819 = vmatpush.bf16.msrb.mxu0 %v2035_v17  ;;  %832 = vmatpush.bf16.msrb.mxu1 %v2131_v18  ;;  %v2891_v3 = vld [vmem:[#allocation2 + $0x2ec] sm:$0xf]  ;;  %v2279_v10 = vor.u32 %v2867_v63, %v2276_v2  ;;  %v2813_v12 = vld [vmem:[#allocation2 + $0x7c] sm:$0xf]  ;;  %v2864_v13 = vld [vmem:[#allocation2 + $0x214] sm:$0xf]  ;;  %v2171_v15 = vor.u32 %v2840_v6, %v2168_v7 }
  0x24   :  { %v2375_v11 = vor.u32 %v2891_v3, %v2372_v4  ;;  %v2264_v16 = vld [vmem:[#allocation2 + $0x21c] sm:$0xf0]  ;;  %v2888_v17 = vld [vmem:[#allocation2 + $0x2d4] sm:$0xf]  ;;  %v2060_v19 = vld [vmem:[#allocation2 + $0x84] sm:$0xf0] }
  0x25   :  { %845 = vmatpush.bf16.msrb.mxu2 %v2227_v25  ;;  %858 = vmatpush.bf16.msrb.mxu3 %v2323_v26  ;;  %v2360_v18 = vld [vmem:[#allocation2 + $0x2dc] sm:$0xf0]  ;;  %v2837_v20 = vld [vmem:[#allocation2 + $0x13c] sm:$0xf]  ;;  %v2156_v21 = vld [vmem:[#allocation2 + $0x144] sm:$0xf0]  ;;  %v2267_v22 = vor.u32 %v2864_v13, %v2264_v16  ;;  %v2063_v26 = vor.u32 %v2813_v12, %v2060_v19 }
  0x26   :  { %v2363_v23 = vor.u32 %v2888_v17, %v2360_v18  ;;  %v2810_v24 = vld [vmem:[#allocation2 + $0x64] sm:$0xf]  ;;  %v2861_v25 = vld [vmem:[#allocation2 + $0x1fc] sm:$0xf]  ;;  %v2159_v27 = vor.u32 %v2837_v20, %v2156_v21  ;;  %v2252_v28 = vld [vmem:[#allocation2 + $0x204] sm:$0xf0] }
  0x27   :  { %820 = vmatpush.bf16.msrb.mxu0 %v2023_v29  ;;  %833 = vmatpush.bf16.msrb.mxu1 %v2119_v30  ;;  %v2885_v29 = vld [vmem:[#allocation2 + $0x2bc] sm:$0xf]  ;;  %v2348_v30 = vld [vmem:[#allocation2 + $0x2c4] sm:$0xf0]  ;;  %v2048_v31 = vld [vmem:[#allocation2 + $0x6c] sm:$0xf0]  ;;  %v2255_v34 = vor.u32 %v2861_v25, %v2252_v28 }
  0x28   :  { %v2834_v32 = vld [vmem:[#allocation2 + $0x124] sm:$0xf]  ;;  %v2144_v33 = vld [vmem:[#allocation2 + $0x12c] sm:$0xf0]  ;;  %v2351_v35 = vor.u32 %v2885_v29, %v2348_v30  ;;  %v2807_v36 = vld [vmem:[#allocation2 + $0x4c] sm:$0xf] }
  0x29   :  { %846 = vmatpush.bf16.msrb.mxu2 %v2215_v37  ;;  %859 = vmatpush.bf16.msrb.mxu3 %v2311_v38  ;;  %v2858_v37 = vld [vmem:[#allocation2 + $0x1e4] sm:$0xf]  ;;  %v2051_v38 = vor.u32 %v2810_v24, %v2048_v31  ;;  %v2147_v39 = vor.u32 %v2834_v32, %v2144_v33  ;;  %v2240_v41 = vld [vmem:[#allocation2 + $0x1ec] sm:$0xf0]  ;;  %v2831_v45 = vld [vmem:[#allocation2 + $0x10c] sm:$0xf] }
  0x2a   :  { %v2882_v42 = vld [vmem:[#allocation2 + $0x2a4] sm:$0xf]  ;;  %v2132_v46 = vld [vmem:[#allocation2 + $0x114] sm:$0xf0]  ;;  %v2243_v47 = vor.u32 %v2858_v37, %v2240_v41  ;;  %v2804_v51 = vld [vmem:[#allocation2 + $0x34] sm:$0xf] }
  0x2b   :  { %821 = vmatpush.bf16.msrb.mxu0 %v2011_v43  ;;  %834 = vmatpush.bf16.msrb.mxu1 %v2107_v44  ;;  %v2336_v43 = vld [vmem:[#allocation2 + $0x2ac] sm:$0xf0]  ;;  %v2036_v44 = vld [vmem:[#allocation2 + $0x54] sm:$0xf0]  ;;  %v2135_v50 = vor.u32 %v2831_v45, %v2132_v46  ;;  %v2024_v52 = vld [vmem:[#allocation2 + $0x3c] sm:$0xf0] }
  0x2c   :  { %v2339_v48 = vor.u32 %v2882_v42, %v2336_v43  ;;  %v2039_v49 = vor.u32 %v2807_v36, %v2036_v44  ;;  %v2828_v53 = vld [vmem:[#allocation2 + $0xf4] sm:$0xf]  ;;  %v2855_v57 = vld [vmem:[#allocation2 + $0x1cc] sm:$0xf]  ;;  %v2324_v61 = vld [vmem:[#allocation2 + $0x294] sm:$0xf0] }
  0x2d   :  { %847 = vmatpush.bf16.msrb.mxu2 %v2203_v54  ;;  %860 = vmatpush.bf16.msrb.mxu3 %v2299_v55  ;;  %v2120_v54 = vld [vmem:[#allocation2 + $0xfc] sm:$0xf0]  ;;  %v2027_v55 = vor.u32 %v2804_v51, %v2024_v52  ;;  %v2801_v63 = vld [vmem:[#allocation2 + $0x1c] sm:$0xf]  ;;  %v2108_v3 = vld [vmem:[#allocation2 + $0xe4] sm:$0xf0] }
  0x2e   :  { %v2123_v56 = vor.u32 %v2828_v53, %v2120_v54  ;;  %v2852_v5 = vld [vmem:[#allocation2 + $0x1b4] sm:$0xf]  ;;  %v2216_v6 = vld [vmem:[#allocation2 + $0x1bc] sm:$0xf0]  ;;  %v2000_v12 = vld [vmem:[#allocation2 + $0xc] sm:$0xf0] }
  0x2f   :  { %822 = vmatpush.bf16.msrb.mxu0 %v1999_v58  ;;  %835 = vmatpush.bf16.msrb.mxu1 %v2095_v59  ;;  %v2228_v58 = vld [vmem:[#allocation2 + $0x1d4] sm:$0xf0]  ;;  %v2879_v59 = vld [vmem:[#allocation2 + $0x28c] sm:$0xf]  ;;  %v2876_v7 = vld [vmem:[#allocation2 + $0x274] sm:$0xf] }
  0x30   :  { %v2231_v60 = vor.u32 %v2855_v57, %v2228_v58  ;;  %v2327_v62 = vor.u32 %v2879_v59, %v2324_v61  ;;  %v2849_v17 = vld [vmem:[#allocation2 + $0x19c] sm:$0xf]  ;;  %v2204_v18 = vld [vmem:[#allocation2 + $0x1a4] sm:$0xf0]  ;;  %v2192_v24 = vld [vmem:[#allocation2 + $0x18c] sm:$0xf0] }
  0x31   :  { %848 = vmatpush.bf16.msrb.mxu2 %v2191_v8  ;;  %861 = vmatpush.bf16.msrb.mxu3 %v2287_v9  ;;  %v2219_v8 = vor.u32 %v2852_v5, %v2216_v6  ;;  %v2312_v9 = vld [vmem:[#allocation2 + $0x27c] sm:$0xf0]  ;;  %v2207_v19 = vor.u32 %v2849_v17, %v2204_v18  ;;  %v2873_v20 = vld [vmem:[#allocation2 + $0x25c] sm:$0xf]  ;;  %v2300_v21 = vld [vmem:[#allocation2 + $0x264] sm:$0xf0] }
  0x32   :  { %v50_v29 = vld [vmem:[%s3251_s2] sm:$0xf]  ;;  %v2821_v37 = vld [vmem:[#allocation2 + $0xb8] sm:$0xf0]  ;;  %v2174_v51 = vld [vmem:[#allocation2 + $0x158] sm:$0xf] }
  0x33   :  { %867 = vmatpush.bf16.msra.mxu0 %v2087_v0  ;;  %880 = vmatpush.bf16.msra.mxu1 %v2183_v1  ;;  %v2012_v0 = vld [vmem:[#allocation2 + $0x24] sm:$0xf0]  ;;  %v2825_v1 = vld [vmem:[#allocation2 + $0xdc] sm:$0xf]  ;;  %v52_v30 = vperm.slane %v50_v29, 0  ;;  %v53_v31 = vperm.slane %v50_v29, 1 }
  0x34   :  { %v2015_v2 = vor.u32 %v2801_v63, %v2012_v0  ;;  %v2111_v4 = vor.u32 %v2825_v1, %v2108_v3  ;;  %v54_v43 = vperm.slane %v50_v29, 2  ;;  %v55_v44 = vperm.slane %v50_v29, 3  ;;  %v2842_v52 = vld [vmem:[#allocation2 + $0x160] sm:$0xf0]  ;;  %v2869_v57 = vld [vmem:[#allocation2 + $0x238] sm:$0xf0] }
  0x35   :  { %893 = vmatpush.bf16.msra.mxu2 %v2279_v10  ;;  %906 = vmatpush.bf16.msra.mxu3 %v2375_v11  ;;  %v2315_v10 = vor.u32 %v2876_v7, %v2312_v9  ;;  %v2798_v11 = vld [vmem:[#allocation2 + $0x4] sm:$0xf]  ;;  %v2378_v58 = vld [vmem:[#allocation2 + $0x2f0] sm:$0xf]  ;;  %v2175_v61 = vor.u32 %v2842_v52, %v2174_v51  ;;  %v2893_v63 = vld [vmem:[#allocation2 + $0x2f8] sm:$0xf0] }
  0x36   :  { %v2003_v13 = vor.u32 %v2798_v11, %v2000_v12  ;;  %v2066_v1 = vld [vmem:[#allocation2 + $0x80] sm:$0xf]  ;;  %v2866_v11 = vld [vmem:[#allocation2 + $0x220] sm:$0xf0]  ;;  %v2054_v17 = vld [vmem:[#allocation2 + $0x68] sm:$0xf] }
  0x37   :  { %868 = vmatpush.bf16.msra.mxu0 %v2075_v14  ;;  %881 = vmatpush.bf16.msra.mxu1 %v2171_v15  ;;  %v2822_v14 = vld [vmem:[#allocation2 + $0xc4] sm:$0xf]  ;;  %v2096_v15 = vld [vmem:[#allocation2 + $0xcc] sm:$0xf0]  ;;  %v2162_v3 = vld [vmem:[#allocation2 + $0x140] sm:$0xf] }
  0x38   :  { %v2099_v16 = vor.u32 %v2822_v14, %v2096_v15  ;;  %v2366_v15 = vld [vmem:[#allocation2 + $0x2d8] sm:$0xf]  ;;  %v2812_v18 = vld [vmem:[#allocation2 + $0x70] sm:$0xf0]  ;;  %v2354_v29 = vld [vmem:[#allocation2 + $0x2c0] sm:$0xf] }
  0x39   :  { %894 = vmatpush.bf16.msra.mxu2 %v2267_v22  ;;  %907 = vmatpush.bf16.msra.mxu3 %v2363_v23  ;;  %v2303_v22 = vor.u32 %v2873_v20, %v2300_v21  ;;  %v2846_v23 = vld [vmem:[#allocation2 + $0x184] sm:$0xf]  ;;  %v2836_v20 = vld [vmem:[#allocation2 + $0x130] sm:$0xf0]  ;;  %v2234_v52 = vld [vmem:[#allocation2 + $0x1d0] sm:$0xf] }
  0x3a   :  { %v2195_v25 = vor.u32 %v2846_v23, %v2192_v24  ;;  %s3029_s10 = smov 1   ;;  %vm1003_vm2 = vcmask 7168   ;;  %vm1969_vm3 = vcmask 15368  }
  0x3b   :  { %869 = vmatpush.bf16.msra.mxu0 %v2063_v26  ;;  %882 = vmatpush.bf16.msra.mxu1 %v2159_v27  ;;  %v2870_v26 = vld [vmem:[#allocation2 + $0x244] sm:$0xf]  ;;  %v2288_v27 = vld [vmem:[#allocation2 + $0x24c] sm:$0xf0] }
  0x3c   :  { %v2291_v28 = vor.u32 %v2870_v26, %v2288_v27  ;;  %v2055_v26 = vor.u32 %v2812_v18, %v2054_v17  ;;  %v2210_v18 = vld [vmem:[#allocation2 + $0x1a0] sm:$0xf] }
  0x3d   :  { %895 = vmatpush.bf16.msra.mxu2 %v2255_v34  ;;  %908 = vmatpush.bf16.msra.mxu3 %v2351_v35  ;;  %v2090_v34 = vld [vmem:[#allocation2 + $0xb0] sm:$0xf] }
  0x3e   :  { %v2091_v45 = vor.u32 %v2821_v37, %v2090_v34  ;;  %v2833_v34 = vld [vmem:[#allocation2 + $0x118] sm:$0xf0]  ;;  %v2246_v37 = vld [vmem:[#allocation2 + $0x1e8] sm:$0xf] }
  0x3f   :  { %870 = vmatpush.bf16.msra.mxu0 %v2051_v38  ;;  %883 = vmatpush.bf16.msra.mxu1 %v2147_v39  ;;  %v2186_v38 = vld [vmem:[#allocation2 + $0x170] sm:$0xf]  ;;  %v2845_v39 = vld [vmem:[#allocation2 + $0x178] sm:$0xf0] }
  0x40   :  { %v2187_v46 = vor.u32 %v2845_v39, %v2186_v38  ;;  %v2860_v38 = vld [vmem:[#allocation2 + $0x1f0] sm:$0xf0]  ;;  %v2342_v39 = vld [vmem:[#allocation2 + $0x2a8] sm:$0xf] }
  0x41   :  { %896 = vmatpush.bf16.msra.mxu2 %v2243_v47  ;;  %909 = vmatpush.bf16.msra.mxu3 %v2339_v48  ;;  %v2078_v47 = vld [vmem:[#allocation2 + $0x98] sm:$0xf]  ;;  %v2818_v48 = vld [vmem:[#allocation2 + $0xa0] sm:$0xf0] }
  0x43   :  { %871 = vmatpush.bf16.msra.mxu0 %v2039_v49  ;;  %884 = vmatpush.bf16.msra.mxu1 %v2135_v50 }
  0x45   :  { %897 = vmatpush.bf16.msra.mxu2 %v2231_v60  ;;  %910 = vmatpush.bf16.msra.mxu3 %v2327_v62 }
  0x47   :  { %872 = vmatpush.bf16.msra.mxu0 %v2027_v55  ;;  %885 = vmatpush.bf16.msra.mxu1 %v2123_v56  ;;  %v2079_v55 = vor.u32 %v2818_v48, %v2078_v47  ;;  %v2282_v56 = vld [vmem:[#allocation2 + $0x230] sm:$0xf]  ;;  %v2830_v47 = vld [vmem:[#allocation2 + $0x100] sm:$0xf0]  ;;  %v2247_v48 = vor.u32 %v2860_v38, %v2246_v37  ;;  %v2848_v37 = vld [vmem:[#allocation2 + $0x190] sm:$0xf0] }
  0x48   :  { %v2283_v7 = vor.u32 %v2869_v57, %v2282_v56  ;;  %v2384_v56 = vld [vmem:[%s3250_s1 + $0x50] sm:$0x33]  ;;  %v2294_v38 = vld [vmem:[#allocation2 + $0x248] sm:$0xf] }
  0x49   :  { %898 = vmatpush.bf16.msra.mxu2 %v2219_v8  ;;  %911 = vmatpush.bf16.msra.mxu3 %v2315_v10  ;;  %v2379_v8 = vor.u32 %v2893_v63, %v2378_v58  ;;  %v2270_v10 = vld [vmem:[#allocation2 + $0x218] sm:$0xf] }
  0x4a   :  { %v2271_v23 = vor.u32 %v2866_v11, %v2270_v10  ;;  %v2800_v10 = vld [vmem:[#allocation2 + $0x10] sm:$0xf0] }
  0x4b   :  { %873 = vmatpush.bf16.msra.mxu0 %v2015_v2  ;;  %886 = vmatpush.bf16.msra.mxu1 %v2111_v4  ;;  %v2815_v2 = vld [vmem:[#allocation2 + $0x88] sm:$0xf0] }
  0x4c   :  { %v2839_v4 = vld [vmem:[#allocation2 + $0x148] sm:$0xf0]  ;;  %v2067_v9 = vor.u32 %v2815_v2, %v2066_v1  ;;  %v2222_v1 = vld [vmem:[#allocation2 + $0x1b8] sm:$0xf]  ;;  %v2854_v2 = vld [vmem:[#allocation2 + $0x1c0] sm:$0xf0] }
  0x4d   :  { %899 = vmatpush.bf16.msra.mxu2 %v2207_v19  ;;  %912 = vmatpush.bf16.msra.mxu3 %v2303_v22  ;;  %v2163_v14 = vor.u32 %v2839_v4, %v2162_v3  ;;  %v2150_v19 = vld [vmem:[#allocation2 + $0x128] sm:$0xf]  ;;  %v1037_v3 = vunpack.c.l.b16 %v2384_v56  ;;  %v1038_v4 = vunpack.c.h.b16 %v2384_v56  ;;  %v2223_v11 = vor.u32 %v2854_v2, %v2222_v1  ;;  %v2470_v1 = vld [vmem:[#allocation2 + $0x378] sm:$0xf]  ;;  %v2914_v2 = vld [vmem:[#allocation2 + $0x380] sm:$0xf0] }
  0x4e   :  { %v2151_v27 = vor.u32 %v2836_v20, %v2150_v19 }
  0x4f   :  { %874 = vmatpush.bf16.msra.mxu0 %v2003_v13  ;;  %887 = vmatpush.bf16.msra.mxu1 %v2099_v16  ;;  %v2890_v16 = vld [vmem:[#allocation2 + $0x2e0] sm:$0xf0]  ;;  %v1045_v19 = vpack.c.b16 %v1037_v3, %v1037_v3  ;;  %v1046_v20 = vpack.c.b16 %v1038_v4, %v1038_v4  ;;  %v2566_v3 = vld [vmem:[#allocation2 + $0x438] sm:$0xf]  ;;  %v2471_v4 = vor.u32 %v2914_v2, %v2470_v1  ;;  %v2734_v2 = vld [vmem:[#allocation2 + $0x588] sm:$0xf] }
  0x50   :  { %v2367_v24 = vor.u32 %v2890_v16, %v2366_v15  ;;  %v2824_v15 = vld [vmem:[#allocation2 + $0xd0] sm:$0xf0]  ;;  %v2385_v16 = vld [vmem:[%s3250_s1 + $0x58] sm:$0x33] }
  0x51   :  { %900 = vmatpush.bf16.msra.mxu2 %v2195_v25  ;;  %913 = vmatpush.bf16.msra.mxu3 %v2291_v28  ;;  %v2258_v25 = vld [vmem:[#allocation2 + $0x200] sm:$0xf]  ;;  %v2863_v28 = vld [vmem:[#allocation2 + $0x208] sm:$0xf0] }
  0x8f   :  { %v116_v32 = vpop.f32.mrf.mxu0  ;;  %v129_v33 = vpop.f32.mrf.mxu1 }
  0x90   :  { %v117_v35 = vadd.f32 %v116_v32, %v52_v30  ;;  %v130_v36 = vadd.f32 %v129_v33, %v53_v31  ;;  %v2887_v30 = vld [vmem:[#allocation2 + $0x2c8] sm:$0xf0]  ;;  %v2042_v31 = vld [vmem:[#allocation2 + $0x50] sm:$0xf]  ;;  %v2809_v32 = vld [vmem:[#allocation2 + $0x58] sm:$0xf0] }
  0x91   :  { %v2138_v33 = vld [vmem:[#allocation2 + $0x110] sm:$0xf] }
  0x92   :  { %v159_v41 = vmax.f32 %v117_v35, 0.0  ;;  %v160_v42 = vmax.f32 %v130_v36, 0.0  ;;  %v2259_v35 = vor.u32 %v2863_v28, %v2258_v25  ;;  %v2355_v36 = vor.u32 %v2887_v30, %v2354_v29  ;;  %v2198_v28 = vld [vmem:[#allocation2 + $0x188] sm:$0xf]  ;;  %v2389_v29 = vld [vmem:[%s3250_s1 + $0x30] sm:$0xf] }
  0x93   :  { %v2896_v30 = vld [vmem:[%s3250_s1 + $0x3c] sm:$0xf0] }
  0x94   :  { %v3123_v49 = vpack.c.bf16 %v159_v41, %v159_v41  ;;  %v3125_v50 = vpack.c.bf16 %v160_v42, %v160_v42  ;;  %v2884_v41 = vld [vmem:[#allocation2 + $0x2b0] sm:$0xf0]  ;;  %v2043_v42 = vor.u32 %v2809_v32, %v2042_v31 }
  0x95   :  { %v2343_v51 = vor.u32 %v2884_v41, %v2342_v39  ;;  %v2872_v39 = vld [vmem:[#allocation2 + $0x250] sm:$0xf0] }
  0x96   :  { %823 = vmatmul.bf16.vlgmr.msrb.gmra.mxu0 %v3123_v49  ;;  %836 = vmatmul.bf16.vlgmr.msrb.gmra.mxu1 %v3125_v50 }
  0x97   :  { %v142_v53 = vpop.f32.mrf.mxu2  ;;  %v155_v54 = vpop.f32.mrf.mxu3  ;;  %919 = vmatpush.bf16.msrb.mxu0 %v2091_v45  ;;  %932 = vmatpush.bf16.msrb.mxu1 %v2187_v46  ;;  %v2806_v45 = vld [vmem:[#allocation2 + $0x40] sm:$0xf0]  ;;  %v2126_v46 = vld [vmem:[#allocation2 + $0xf8] sm:$0xf] }
  0x98   :  { %v143_v59 = vadd.f32 %v142_v53, %v54_v43  ;;  %v156_v60 = vadd.f32 %v155_v54, %v55_v44  ;;  %v118_v62 = vpop.f32.mrf.mxu0  ;;  %v131_v0 = vpop.f32.mrf.mxu1  ;;  %v2139_v43 = vor.u32 %v2833_v34, %v2138_v33  ;;  %v2030_v44 = vld [vmem:[#allocation2 + $0x38] sm:$0xf]  ;;  %v2857_v53 = vld [vmem:[#allocation2 + $0x1d8] sm:$0xf0]  ;;  %v2330_v54 = vld [vmem:[#allocation2 + $0x290] sm:$0xf]  ;;  %v2127_v58 = vor.u32 %v2830_v47, %v2126_v46 }
  0x99   :  { %v2031_v57 = vor.u32 %v2806_v45, %v2030_v44  ;;  %v2827_v62 = vld [vmem:[#allocation2 + $0xe8] sm:$0xf0]  ;;  %v2235_v63 = vor.u32 %v2857_v53, %v2234_v52  ;;  %v1054_v33 = vsel %vm94_vm0, %v1045_v19, 0  ;;  %v1057_v34 = vsel %vm94_vm0, %v1046_v20, 0  ;;  %v2920_v46 = vld [vmem:[#allocation2 + $0x3b0] sm:$0xf0] }
  0x9a   :  { %v161_v5 = vmax.f32 %v143_v59, 0.0  ;;  %v162_v6 = vmax.f32 %v156_v60, 0.0  ;;  %v2018_v59 = vld [vmem:[#allocation2 + $0x20] sm:$0xf]  ;;  %v2803_v60 = vld [vmem:[#allocation2 + $0x28] sm:$0xf0]  ;;  %v2390_v44 = vor.u32 %v2896_v30, %v2389_v29  ;;  %v2295_v52 = vor.u32 %v2872_v39, %v2294_v38 }
  0x9b   :  { %920 = vmatpush.bf16.msrb.mxu0 %v2079_v55  ;;  %933 = vmatpush.bf16.msrb.mxu1 %v2175_v61  ;;  %v2881_v55 = vld [vmem:[#allocation2 + $0x298] sm:$0xf0]  ;;  %v2114_v61 = vld [vmem:[#allocation2 + $0xe0] sm:$0xf]  ;;  %v2590_v47 = vld [vmem:[#allocation2 + $0x468] sm:$0xf] }
  0x9c   :  { %v3129_v12 = vpack.c.bf16 %v161_v5, %v161_v5  ;;  %v3131_v13 = vpack.c.bf16 %v162_v6, %v162_v6  ;;  %v2331_v0 = vor.u32 %v2881_v55, %v2330_v54  ;;  %v2318_v5 = vld [vmem:[#allocation2 + $0x278] sm:$0xf]  ;;  %v2878_v6 = vld [vmem:[#allocation2 + $0x280] sm:$0xf0]  ;;  %v2897_v54 = vld [vmem:[%s3250_s1 + $0x44] sm:$0xf0] }
  0x9d   :  { %v2319_v17 = vor.u32 %v2878_v6, %v2318_v5  ;;  %v2397_v53 = vld [vmem:[%s3250_s1 + $0x38] sm:$0xf]  ;;  %v2938_v5 = vld [vmem:[#allocation2 + $0x440] sm:$0xf0]  ;;  %v2446_v20 = vld [vmem:[#allocation2 + $0x348] sm:$0xf] }
  0x9e   :  { %849 = vmatmul.bf16.vlgmr.msrb.gmra.mxu2 %v3129_v12  ;;  %862 = vmatmul.bf16.vlgmr.msrb.gmra.mxu3 %v3131_v13  ;;  %v2567_v6 = vor.u32 %v2938_v5, %v2566_v3  ;;  %v2770_v29 = vld [vmem:[#allocation2 + $0x5d0] sm:$0xf]  ;;  %v2989_v30 = vld [vmem:[#allocation2 + $0x5d8] sm:$0xf0]  ;;  %v2962_v39 = vld [vmem:[#allocation2 + $0x500] sm:$0xf0] }
  0x9f   :  { %v144_v21 = vpop.f32.mrf.mxu2  ;;  %v157_v22 = vpop.f32.mrf.mxu3  ;;  %945 = vmatpush.bf16.msrb.mxu2 %v2283_v7  ;;  %958 = vmatpush.bf16.msrb.mxu3 %v2379_v8  ;;  %v2019_v7 = vor.u32 %v2803_v60, %v2018_v59  ;;  %v2115_v8 = vor.u32 %v2827_v62, %v2114_v61  ;;  %v2398_v59 = vor.u32 %v2897_v54, %v2397_v53  ;;  %v2482_v61 = vld [vmem:[#allocation2 + $0x390] sm:$0xf]  ;;  %v2917_v62 = vld [vmem:[#allocation2 + $0x398] sm:$0xf0]  ;;  %v2650_v53 = vld [vmem:[#allocation2 + $0x4e0] sm:$0xf] }
  0xa0   :  { %921 = vmatpush.bf16.msrb.mxu0 %v2067_v9  ;;  %934 = vmatpush.bf16.msrb.mxu1 %v2163_v14  ;;  %v2006_v9 = vld [vmem:[#allocation2 + $0x8] sm:$0xf]  ;;  %v2851_v21 = vld [vmem:[#allocation2 + $0x1a8] sm:$0xf0]  ;;  %v2306_v22 = vld [vmem:[#allocation2 + $0x260] sm:$0xf] }
  0xa1   :  { %v2102_v14 = vld [vmem:[#allocation2 + $0xc8] sm:$0xf]  ;;  %v2211_v31 = vor.u32 %v2851_v21, %v2210_v18  ;;  %v2992_v18 = vld [vmem:[#allocation2 + $0x5f0] sm:$0xf0]  ;;  %v2959_v54 = vld [vmem:[#allocation2 + $0x4e8] sm:$0xf0] }
  0xa2   :  { %v2103_v25 = vor.u32 %v2824_v15, %v2102_v14  ;;  %v2968_v14 = vld [vmem:[#allocation2 + $0x530] sm:$0xf0] }
  0xa3   :  { %946 = vmatpush.bf16.msrb.mxu2 %v2271_v23  ;;  %959 = vmatpush.bf16.msrb.mxu3 %v2367_v24  ;;  %v2875_v23 = vld [vmem:[#allocation2 + $0x268] sm:$0xf0]  ;;  %v2007_v24 = vor.u32 %v2800_v10, %v2006_v9  ;;  %v2554_v9 = vld [vmem:[#allocation2 + $0x420] sm:$0xf]  ;;  %v2908_v21 = vld [vmem:[#allocation2 + $0x350] sm:$0xf0] }
  0xa4   :  { %922 = vmatpush.bf16.msrb.mxu0 %v2055_v26  ;;  %935 = vmatpush.bf16.msrb.mxu1 %v2151_v27  ;;  %v1039_v26 = vunpack.c.l.b16 %v2385_v16  ;;  %v1040_v27 = vunpack.c.h.b16 %v2385_v16  ;;  %v2307_v32 = vor.u32 %v2875_v23, %v2306_v22  ;;  %v2935_v10 = vld [vmem:[#allocation2 + $0x428] sm:$0xf0]  ;;  %v2542_v22 = vld [vmem:[#allocation2 + $0x408] sm:$0xf]  ;;  %v2447_v23 = vor.u32 %v2908_v21, %v2446_v20  ;;  %v2980_v3 = vld [vmem:[#allocation2 + $0x590] sm:$0xf0] }
  0xa5   :  { %v2555_v15 = vor.u32 %v2935_v10, %v2554_v9  ;;  %v2735_v5 = vor.u32 %v2980_v3, %v2734_v2  ;;  %v2626_v10 = vld [vmem:[#allocation2 + $0x4b0] sm:$0xf]  ;;  %v2940_v21 = vld [vmem:[#allocation2 + $0x454] sm:$0xf]  ;;  %v2676_v2 = vld [vmem:[#allocation2 + $0x51c] sm:$0xf0] }
  0xa6   :  { %875 = vmatmul.bf16.vlgmr.msra.gmra.mxu0 %v3123_v49  ;;  %888 = vmatmul.bf16.vlgmr.msra.gmra.mxu1 %v3125_v50  ;;  %v1047_v41 = vpack.c.b16 %v1039_v26, %v1039_v26  ;;  %v2965_v26 = vld [vmem:[#allocation2 + $0x518] sm:$0xf0] }
  0xa7   :  { %947 = vmatpush.bf16.msrb.mxu2 %v2259_v35  ;;  %960 = vmatpush.bf16.msrb.mxu3 %v2355_v36  ;;  %v2894_v35 = vld [vmem:[%s3250_s1 + $0x34] sm:$0xf]  ;;  %v2391_v36 = vld [vmem:[%s3250_s1 + $0x40] sm:$0xf0] }
  0xa8   :  { %923 = vmatpush.bf16.msrb.mxu0 %v2043_v42  ;;  %936 = vmatpush.bf16.msrb.mxu1 %v2139_v43  ;;  %v1048_v42 = vpack.c.b16 %v1040_v27, %v1040_v27  ;;  %v2494_v43 = vld [vmem:[#allocation2 + $0x3a8] sm:$0xf]  ;;  %v2394_v45 = vor.u32 %v2894_v35, %v2391_v36  ;;  %v1060_v55 = vsel %vm94_vm0, %v1047_v41, 0  ;;  %v2530_v35 = vld [vmem:[#allocation2 + $0x3f0] sm:$0xf] }
  0xa9   :  { %v2929_v36 = vld [vmem:[#allocation2 + $0x3f8] sm:$0xf0]  ;;  %v2758_v41 = vld [vmem:[#allocation2 + $0x5b8] sm:$0xf] }
  0xaa   :  { %v1063_v56 = vsel %vm94_vm0, %v1048_v42, 0  ;;  %v2531_v38 = vor.u32 %v2929_v36, %v2530_v35  ;;  %v2986_v42 = vld [vmem:[#allocation2 + $0x5c0] sm:$0xf0]  ;;  %v2937_v35 = vld [vmem:[#allocation2 + $0x43c] sm:$0xf] }
  0xab   :  { %948 = vmatpush.bf16.msrb.mxu2 %v2247_v48  ;;  %961 = vmatpush.bf16.msrb.mxu3 %v2343_v51  ;;  %v2944_v48 = vld [vmem:[#allocation2 + $0x470] sm:$0xf0]  ;;  %v2199_v51 = vor.u32 %v2848_v37, %v2198_v28  ;;  %v2662_v37 = vld [vmem:[#allocation2 + $0x4f8] sm:$0xf]  ;;  %v2568_v36 = vld [vmem:[#allocation2 + $0x444] sm:$0xf0] }
  0xac   :  { %924 = vmatpush.bf16.msrb.mxu0 %v2031_v57  ;;  %937 = vmatpush.bf16.msrb.mxu1 %v2127_v58  ;;  %v2895_v57 = vld [vmem:[%s3250_s1 + $0x3c] sm:$0xf]  ;;  %v2591_v58 = vor.u32 %v2944_v48, %v2590_v47  ;;  %v2902_v47 = vld [vmem:[#allocation2 + $0x320] sm:$0xf0]  ;;  %v2518_v48 = vld [vmem:[#allocation2 + $0x3d8] sm:$0xf] }
  0xae   :  { %901 = vmatmul.bf16.vlgmr.msra.gmra.mxu2 %v3129_v12  ;;  %914 = vmatmul.bf16.vlgmr.msra.gmra.mxu3 %v3131_v13 }
  0xaf   :  { %949 = vmatpush.bf16.msrb.mxu2 %v2235_v63  ;;  %962 = vmatpush.bf16.msrb.mxu3 %v2331_v0  ;;  %v2578_v63 = vld [vmem:[#allocation2 + $0x450] sm:$0xf]  ;;  %v2941_v0 = vld [vmem:[#allocation2 + $0x458] sm:$0xf0] }
  0xb0   :  { %925 = vmatpush.bf16.msrb.mxu0 %v2019_v7  ;;  %938 = vmatpush.bf16.msrb.mxu1 %v2115_v8  ;;  %v2458_v7 = vld [vmem:[#allocation2 + $0x360] sm:$0xf]  ;;  %v2911_v8 = vld [vmem:[#allocation2 + $0x368] sm:$0xf0] }
  0xb3   :  { %950 = vmatpush.bf16.msrb.mxu2 %v2223_v11  ;;  %963 = vmatpush.bf16.msrb.mxu3 %v2319_v17  ;;  %v2686_v11 = vld [vmem:[#allocation2 + $0x528] sm:$0xf] }
  0xb4   :  { %926 = vmatpush.bf16.msrb.mxu0 %v2007_v24  ;;  %939 = vmatpush.bf16.msrb.mxu1 %v2103_v25  ;;  %v2687_v16 = vor.u32 %v2968_v14, %v2686_v11  ;;  %v2782_v17 = vld [vmem:[#allocation2 + $0x5e8] sm:$0xf]  ;;  %v2932_v24 = vld [vmem:[#allocation2 + $0x410] sm:$0xf0]  ;;  %v2674_v25 = vld [vmem:[#allocation2 + $0x510] sm:$0xf] }
  0xb5   :  { %v2783_v19 = vor.u32 %v2992_v18, %v2782_v17  ;;  %v2543_v27 = vor.u32 %v2932_v24, %v2542_v22  ;;  %v2675_v28 = vor.u32 %v2965_v26, %v2674_v25  ;;  %v2953_v11 = vld [vmem:[#allocation2 + $0x4b8] sm:$0xf0]  ;;  %v2722_v14 = vld [vmem:[#allocation2 + $0x570] sm:$0xf]  ;;  %v2916_v17 = vld [vmem:[#allocation2 + $0x394] sm:$0xf] }
  0xb6   :  { %v2484_v18 = vld [vmem:[#allocation2 + $0x39c] sm:$0xf0]  ;;  %v2614_v26 = vld [vmem:[#allocation2 + $0x498] sm:$0xf] }
  0xb7   :  { %951 = vmatpush.bf16.msrb.mxu2 %v2211_v31  ;;  %964 = vmatpush.bf16.msrb.mxu3 %v2307_v32  ;;  %v2771_v31 = vor.u32 %v2989_v30, %v2770_v29  ;;  %v2434_v32 = vld [vmem:[#allocation2 + $0x330] sm:$0xf]  ;;  %v2487_v20 = vor.u32 %v2916_v17, %v2484_v18  ;;  %v2580_v22 = vld [vmem:[#allocation2 + $0x45c] sm:$0xf0]  ;;  %v2710_v30 = vld [vmem:[#allocation2 + $0x558] sm:$0xf] }
  0xb8   :  { %1071 = vmatpush.bf16.msra.mxu0 %v1054_v33  ;;  %1084 = vmatpush.bf16.msra.mxu1 %v1057_v34  ;;  %v2905_v33 = vld [vmem:[#allocation2 + $0x338] sm:$0xf0]  ;;  %v2532_v17 = vld [vmem:[#allocation2 + $0x3fc] sm:$0xf0] }
  0xb9   :  { %927 = vmatmul.bf16.vlgmr.msrb.gmra.mxu0 %v3123_v49  ;;  %940 = vmatmul.bf16.vlgmr.msrb.gmra.mxu1 %v3125_v50  ;;  %v2399_v49 = vld [vmem:[%s3250_s1 + $0x48] sm:$0xf0]  ;;  %v2495_v50 = vor.u32 %v2920_v46, %v2494_v43  ;;  %v2435_v34 = vor.u32 %v2905_v33, %v2434_v32  ;;  %v3188_v43 = vld [vmem:[%s3253_s4] sm:$0x7]  ;;  %v2422_v46 = vld [vmem:[#allocation2 + $0x318] sm:$0xf] }
  0xba   :  { %v2402_v60 = vor.u32 %v2895_v57, %v2399_v49  ;;  %v2746_v57 = vld [vmem:[#allocation2 + $0x5a0] sm:$0xf]  ;;  %v2983_v49 = vld [vmem:[#allocation2 + $0x5a8] sm:$0xf0]  ;;  %v2913_v32 = vld [vmem:[#allocation2 + $0x37c] sm:$0xf] }
  0xbb   :  { %952 = vmatpush.bf16.msrb.mxu2 %v2199_v51  ;;  %965 = vmatpush.bf16.msrb.mxu3 %v2295_v52  ;;  %v2423_v51 = vor.u32 %v2902_v47, %v2422_v46  ;;  %v2926_v52 = vld [vmem:[#allocation2 + $0x3e0] sm:$0xf0]  ;;  %v2971_v46 = vld [vmem:[#allocation2 + $0x548] sm:$0xf0]  ;;  %v2961_v18 = vld [vmem:[#allocation2 + $0x4fc] sm:$0xf] }
  0xbc   :  { %1072 = vmatpush.bf16.msra.mxu0 %v2390_v44  ;;  %1085 = vmatpush.bf16.msra.mxu1 %v2394_v45  ;;  %v2663_v44 = vor.u32 %v2962_v39, %v2662_v37  ;;  %v2759_v45 = vor.u32 %v2986_v42, %v2758_v41  ;;  %v2571_v39 = vor.u32 %v2937_v35, %v2568_v36  ;;  %v2602_v41 = vld [vmem:[#allocation2 + $0x480] sm:$0xf]  ;;  %v2947_v42 = vld [vmem:[#allocation2 + $0x488] sm:$0xf0]  ;;  %v2910_v47 = vld [vmem:[#allocation2 + $0x364] sm:$0xf] }
  0xbd   :  { %v2652_v36 = vld [vmem:[#allocation2 + $0x4ec] sm:$0xf0] }
  0xbe   :  { %953 = vmatmul.bf16.vlgmr.msrb.gmra.mxu2 %v3129_v12  ;;  %966 = vmatmul.bf16.vlgmr.msrb.gmra.mxu3 %v3131_v13  ;;  %v2483_v12 = vor.u32 %v2917_v62, %v2482_v61  ;;  %v2579_v13 = vor.u32 %v2941_v0, %v2578_v63  ;;  %v2506_v61 = vld [vmem:[#allocation2 + $0x3c0] sm:$0xf]  ;;  %v2923_v63 = vld [vmem:[#allocation2 + $0x3c8] sm:$0xf0]  ;;  %v2956_v0 = vld [vmem:[#allocation2 + $0x4d0] sm:$0xf0] }
  0xbf   :  { %1097 = vmatpush.bf16.msra.mxu2 %v1060_v55  ;;  %1110 = vmatpush.bf16.msra.mxu3 %v1063_v56  ;;  %v2519_v55 = vor.u32 %v2926_v52, %v2518_v48  ;;  %v2651_v56 = vor.u32 %v2959_v54, %v2650_v53  ;;  %v2460_v48 = vld [vmem:[#allocation2 + $0x36c] sm:$0xf0]  ;;  %v2934_v53 = vld [vmem:[#allocation2 + $0x424] sm:$0xf] }
  0xc0   :  { %1775 = vmatpush.bf16.msrb.mxu0 %v2495_v50  ;;  %1788 = vmatpush.bf16.msrb.mxu1 %v2591_v58  ;;  %v297_v50 = vperm.slane %v3188_v43, 0  ;;  %v2747_v58 = vor.u32 %v2983_v49, %v2746_v57  ;;  %v2463_v52 = vor.u32 %v2910_v47, %v2460_v48  ;;  %v2556_v54 = vld [vmem:[#allocation2 + $0x42c] sm:$0xf0]  ;;  %v2688_v57 = vld [vmem:[#allocation2 + $0x534] sm:$0xf0] }
  0xc1   :  { %v2991_v49 = vld [vmem:[#allocation2 + $0x5ec] sm:$0xf]  ;;  %v2412_v47 = vld [vmem:[#allocation2 + $0x30c] sm:$0xf0]  ;;  %v2922_v48 = vld [vmem:[#allocation2 + $0x3c4] sm:$0xf] }
  0xc3   :  { %1098 = vmatpush.bf16.msra.mxu2 %v2398_v59  ;;  %1111 = vmatpush.bf16.msra.mxu3 %v2402_v60  ;;  %v2410_v59 = vld [vmem:[#allocation2 + $0x300] sm:$0xf]  ;;  %v2899_v60 = vld [vmem:[#allocation2 + $0x308] sm:$0xf0] }
  0xc4   :  { %1776 = vmatpush.bf16.msrb.mxu0 %v2483_v12  ;;  %1789 = vmatpush.bf16.msrb.mxu1 %v2579_v13  ;;  %v2411_v62 = vor.u32 %v2899_v60, %v2410_v59  ;;  %v2638_v12 = vld [vmem:[#allocation2 + $0x4c8] sm:$0xf]  ;;  %v2507_v13 = vor.u32 %v2923_v63, %v2506_v61  ;;  %v2448_v63 = vld [vmem:[#allocation2 + $0x354] sm:$0xf0] }
  0xc5   :  { %v2639_v1 = vor.u32 %v2956_v0, %v2638_v12  ;;  %v2931_v12 = vld [vmem:[#allocation2 + $0x40c] sm:$0xf] }
  0xc7   :  { %1801 = vmatpush.bf16.msrb.mxu2 %v2687_v16  ;;  %1814 = vmatpush.bf16.msrb.mxu3 %v2783_v19  ;;  %v2977_v16 = vld [vmem:[#allocation2 + $0x578] sm:$0xf0] }
  0xc8   :  { %1777 = vmatpush.bf16.msrb.mxu0 %v2471_v4  ;;  %1790 = vmatpush.bf16.msrb.mxu1 %v2567_v6  ;;  %v2919_v4 = vld [vmem:[#allocation2 + $0x3ac] sm:$0xf]  ;;  %v2496_v6 = vld [vmem:[#allocation2 + $0x3b4] sm:$0xf0]  ;;  %v2723_v19 = vor.u32 %v2977_v16, %v2722_v14  ;;  %v2928_v14 = vld [vmem:[#allocation2 + $0x3f4] sm:$0xf] }
  0xc9   :  { %2403 = vmatmul.msk.bf16.vlgmr.msra.gmra.mxu0 %vm90_vm1, %v3110_v40  ;;  %2404 = vmatmul.msk.bf16.vlgmr.msra.gmra.mxu1 %vm90_vm1, %v3110_v40  ;;  %v2499_v9 = vor.u32 %v2919_v4, %v2496_v6  ;;  %v2772_v6 = vld [vmem:[#allocation2 + $0x5dc] sm:$0xf0] }
  0xcb   :  { %1802 = vmatpush.bf16.msrb.mxu2 %v2675_v28  ;;  %1815 = vmatpush.bf16.msrb.mxu3 %v2771_v31  ;;  %v2974_v31 = vld [vmem:[#allocation2 + $0x560] sm:$0xf0] }
  0xcc   :  { %1791 = vmatpush.bf16.msrb.mxu1 %v2555_v15  ;;  %v2627_v15 = vor.u32 %v2953_v11, %v2626_v10  ;;  %v2711_v33 = vor.u32 %v2974_v31, %v2710_v30  ;;  %v2904_v10 = vld [vmem:[#allocation2 + $0x334] sm:$0xf]  ;;  %v2436_v11 = vld [vmem:[#allocation2 + $0x33c] sm:$0xf0]  ;;  %v2925_v30 = vld [vmem:[#allocation2 + $0x3dc] sm:$0xf] }
  0xcd   :  { %v2439_v16 = vor.u32 %v2904_v10, %v2436_v11 }
  0xce   :  { %2405 = vmatmul.msk.bf16.vlgmr.msra.gmra.mxu2 %vm90_vm1, %v3110_v40  ;;  %2406 = vmatmul.msk.bf16.vlgmr.msra.gmra.mxu3 %vm90_vm1, %v3110_v40  ;;  %v2459_v40 = vor.u32 %v2911_v8, %v2458_v7  ;;  %v2943_v7 = vld [vmem:[#allocation2 + $0x46c] sm:$0xf]  ;;  %v2592_v8 = vld [vmem:[#allocation2 + $0x474] sm:$0xf0] }
  0xcf   :  { %1803 = vmatpush.bf16.msrb.mxu2 %v2663_v44  ;;  %1816 = vmatpush.bf16.msrb.mxu3 %v2759_v45  ;;  %v2698_v44 = vld [vmem:[#allocation2 + $0x540] sm:$0xf]  ;;  %v2603_v45 = vor.u32 %v2947_v42, %v2602_v41 }
  0xd0   :  { %1778 = vmatpush.bf16.msrb.mxu0 %v2459_v40  ;;  %1792 = vmatpush.bf16.msrb.mxu1 %v2543_v27  ;;  %v2595_v40 = vor.u32 %v2943_v7, %v2592_v8  ;;  %v2950_v27 = vld [vmem:[#allocation2 + $0x4a0] sm:$0xf0]  ;;  %v298_v7 = vperm.slane %v3188_v43, 1 }
  0xd1   :  { %v2615_v29 = vor.u32 %v2950_v27, %v2614_v26 }
  0xd3   :  { %1804 = vmatpush.bf16.msrb.mxu2 %v2651_v56  ;;  %1817 = vmatpush.bf16.msrb.mxu3 %v2747_v58  ;;  %v2559_v56 = vor.u32 %v2934_v53, %v2556_v54  ;;  %v2955_v53 = vld [vmem:[#allocation2 + $0x4cc] sm:$0xf]  ;;  %v2640_v54 = vld [vmem:[#allocation2 + $0x4d4] sm:$0xf0] }
  0xd4   :  { %1779 = vmatpush.bf16.msrb.mxu0 %v2447_v23  ;;  %1793 = vmatpush.bf16.msrb.mxu1 %v2531_v38  ;;  %v2583_v23 = vor.u32 %v2940_v21, %v2580_v22  ;;  %v2985_v22 = vld [vmem:[#allocation2 + $0x5bc] sm:$0xf] }
  0xd7   :  { %1805 = vmatpush.bf16.msrb.mxu2 %v2639_v1  ;;  %1818 = vmatpush.bf16.msrb.mxu3 %v2735_v5  ;;  %v2964_v1 = vld [vmem:[#allocation2 + $0x514] sm:$0xf] }
  0xd8   :  { %1780 = vmatpush.bf16.msrb.mxu0 %v2435_v34  ;;  %1794 = vmatpush.bf16.msrb.mxu1 %v2519_v55  ;;  %v2472_v34 = vld [vmem:[#allocation2 + $0x384] sm:$0xf0]  ;;  %v2967_v55 = vld [vmem:[#allocation2 + $0x52c] sm:$0xf]  ;;  %v2679_v4 = vor.u32 %v2964_v1, %v2676_v2  ;;  %v2988_v5 = vld [vmem:[#allocation2 + $0x5d4] sm:$0xf] }
  0xd9   :  { %v2475_v38 = vor.u32 %v2913_v32, %v2472_v34  ;;  %v2691_v60 = vor.u32 %v2967_v55, %v2688_v57  ;;  %v2775_v8 = vor.u32 %v2988_v5, %v2772_v6  ;;  %v2958_v34 = vld [vmem:[#allocation2 + $0x4e4] sm:$0xf]  ;;  %v2979_v57 = vld [vmem:[#allocation2 + $0x58c] sm:$0xf]  ;;  %v2949_v2 = vld [vmem:[#allocation2 + $0x49c] sm:$0xf] }
  0xda   :  { %v2655_v41 = vor.u32 %v2958_v34, %v2652_v36  ;;  %v299_v6 = vperm.slane %v3188_v43, 2 }
  0xdb   :  { %1806 = vmatpush.bf16.msrb.mxu2 %v2627_v15  ;;  %1819 = vmatpush.bf16.msrb.mxu3 %v2723_v19  ;;  %v2664_v19 = vld [vmem:[#allocation2 + $0x504] sm:$0xf0] }
  0xdc   :  { %1781 = vmatpush.bf16.msrb.mxu0 %v2423_v51  ;;  %1795 = vmatpush.bf16.msrb.mxu1 %v2507_v13  ;;  %v2699_v51 = vor.u32 %v2971_v46, %v2698_v44  ;;  %v2544_v13 = vld [vmem:[#allocation2 + $0x414] sm:$0xf0]  ;;  %v2667_v21 = vor.u32 %v2961_v18, %v2664_v19  ;;  %v2898_v46 = vld [vmem:[#allocation2 + $0x304] sm:$0xf] }
  0xdd   :  { %v2547_v3 = vor.u32 %v2931_v12, %v2544_v13 }
  0xdf   :  { %1807 = vmatpush.bf16.msrb.mxu2 %v2615_v29  ;;  %1820 = vmatpush.bf16.msrb.mxu3 %v2711_v33  ;;  %v2424_v29 = vld [vmem:[#allocation2 + $0x324] sm:$0xf0] }
  0xe0   :  { %1782 = vmatpush.bf16.msrb.mxu0 %v2411_v62  ;;  %1840 = vmatpush.bf16.msra.mxu1 %v2595_v40  ;;  %v2907_v62 = vld [vmem:[#allocation2 + $0x34c] sm:$0xf]  ;;  %v2520_v33 = vld [vmem:[#allocation2 + $0x3e4] sm:$0xf0] }
  0xe1   :  { %v2451_v0 = vor.u32 %v2907_v62, %v2448_v63  ;;  %v2523_v35 = vor.u32 %v2925_v30, %v2520_v33  ;;  %v2976_v62 = vld [vmem:[#allocation2 + $0x574] sm:$0xf]  ;;  %v2724_v63 = vld [vmem:[#allocation2 + $0x57c] sm:$0xf0]  ;;  %v3202_v30 = vld [vmem:[%s3251_s2 + $0x4] sm:$0xf] }
  0xe2   :  { %v1015_v36 = vperm.slane %v3202_v30, 0 }
  0xe3   :  { %1808 = vmatpush.bf16.msrb.mxu2 %v2603_v45  ;;  %1821 = vmatpush.bf16.msrb.mxu3 %v2699_v51  ;;  %v2415_v51 = vor.u32 %v2898_v46, %v2412_v47 }
  0xe4   :  { %1827 = vmatpush.bf16.msra.mxu0 %v2499_v9  ;;  %1841 = vmatpush.bf16.msra.mxu1 %v2583_v23  ;;  %v2760_v23 = vld [vmem:[#allocation2 + $0x5c4] sm:$0xf0] }
  0xe7   :  { %1853 = vmatpush.bf16.msra.mxu2 %v2691_v60  ;;  %v2952_v60 = vld [vmem:[#allocation2 + $0x4b4] sm:$0xf] }
  0xe8   :  { %1828 = vmatpush.bf16.msra.mxu0 %v2487_v20  ;;  %1842 = vmatpush.bf16.msra.mxu1 %v2571_v39  ;;  %v2535_v20 = vor.u32 %v2928_v14, %v2532_v17  ;;  %v2946_v14 = vld [vmem:[#allocation2 + $0x484] sm:$0xf] }
  0xeb   :  { %1854 = vmatpush.bf16.msra.mxu2 %v2679_v4  ;;  %v2973_v4 = vld [vmem:[#allocation2 + $0x55c] sm:$0xf] }
  0xec   :  { %1829 = vmatpush.bf16.msra.mxu0 %v2475_v38  ;;  %1843 = vmatpush.bf16.msra.mxu1 %v2559_v56  ;;  %v2748_v38 = vld [vmem:[#allocation2 + $0x5ac] sm:$0xf0]  ;;  %v2643_v56 = vor.u32 %v2955_v53, %v2640_v54 }
  0xef   :  { %1855 = vmatpush.bf16.msra.mxu2 %v2667_v21 }
  0xf0   :  { %1830 = vmatpush.bf16.msra.mxu0 %v2463_v52  ;;  %1844 = vmatpush.bf16.msra.mxu1 %v2547_v3  ;;  %v2508_v52 = vld [vmem:[#allocation2 + $0x3cc] sm:$0xf0]  ;;  %v2616_v3 = vld [vmem:[#allocation2 + $0x4a4] sm:$0xf0] }
  0xf1   :  { %v2511_v55 = vor.u32 %v2922_v48, %v2508_v52  ;;  %v2502_v48 = vld [vmem:[#allocation2 + $0x3b0] sm:$0xf] }
  0xf3   :  { %1856 = vmatpush.bf16.msra.mxu2 %v2655_v41 }
  0xf4   :  { %1831 = vmatpush.bf16.msra.mxu0 %v2451_v0  ;;  %1845 = vmatpush.bf16.msra.mxu1 %v2535_v20  ;;  %v2727_v0 = vor.u32 %v2976_v62, %v2724_v63  ;;  %v2700_v20 = vld [vmem:[#allocation2 + $0x54c] sm:$0xf0] }
  0xf7   :  { %1857 = vmatpush.bf16.msra.mxu2 %v2643_v56  ;;  %v2945_v56 = vld [vmem:[#allocation2 + $0x478] sm:$0xf0] }
  0xf8   :  { %1832 = vmatpush.bf16.msra.mxu0 %v2439_v16  ;;  %1846 = vmatpush.bf16.msra.mxu1 %v2523_v35  ;;  %v2970_v16 = vld [vmem:[#allocation2 + $0x544] sm:$0xf] }
  0xf9   :  { %v2703_v43 = vor.u32 %v2970_v16, %v2700_v20  ;;  %v2915_v16 = vld [vmem:[#allocation2 + $0x388] sm:$0xf0] }
  0xfc   :  { %1847 = vmatpush.bf16.msra.mxu1 %v2511_v55  ;;  %v2598_v55 = vld [vmem:[#allocation2 + $0x470] sm:$0xf] }
 0x113   :  { %v824_v24 = vpop.f32.mrf.mxu0  ;;  %v837_v25 = vpop.f32.mrf.mxu1 }
 0x114   :  { %v825_v28 = vadd.f32 %v824_v24, %v297_v50  ;;  %v2784_v50 = vld [vmem:[#allocation2 + $0x5f4] sm:$0xf0] }
 0x115   :  { %v2787_v61 = vor.u32 %v2991_v49, %v2784_v50  ;;  %v2736_v49 = vld [vmem:[#allocation2 + $0x594] sm:$0xf0] }
 0x116   :  { %v838_v37 = vadd.f32 %v837_v25, %v825_v28  ;;  %v2763_v25 = vor.u32 %v2985_v22, %v2760_v23  ;;  %v2901_v28 = vld [vmem:[#allocation2 + $0x31c] sm:$0xf]  ;;  %v2739_v50 = vor.u32 %v2979_v57, %v2736_v49 }
 0x117   :  { %1866 = vmatpush.bf16.msra.mxu3 %v2787_v61  ;;  %v2427_v32 = vor.u32 %v2901_v28, %v2424_v29  ;;  %v2628_v61 = vld [vmem:[#allocation2 + $0x4bc] sm:$0xf0] }
 0x118   :  { %v2631_v12 = vor.u32 %v2952_v60, %v2628_v61 }
 0x119   :  { %1833 = vmatpush.bf16.msra.mxu0 %v2427_v32 }
 0x11a   :  { %1858 = vmatpush.bf16.msra.mxu2 %v2631_v12  ;;  %v2599_v12 = vor.u32 %v2945_v56, %v2598_v55 }
 0x11b   :  { %v826_v58 = vpop.f32.mrf.mxu0  ;;  %v839_v59 = vpop.f32.mrf.mxu1  ;;  %1867 = vmatpush.bf16.msra.mxu3 %v2775_v8  ;;  %v2619_v8 = vor.u32 %v2949_v2, %v2616_v3  ;;  %v2918_v3 = vld [vmem:[#allocation2 + $0x3a0] sm:$0xf0] }
 0x11d   :  { %1834 = vmatpush.bf16.msra.mxu0 %v2415_v51  ;;  %v2921_v51 = vld [vmem:[#allocation2 + $0x3b8] sm:$0xf0] }
 0x11e   :  { %1859 = vmatpush.bf16.msra.mxu2 %v2619_v8  ;;  %v2503_v63 = vor.u32 %v2921_v51, %v2502_v48  ;;  %v1017_v8 = vperm.slane %v3202_v30, 2  ;;  %v2966_v48 = vld [vmem:[#allocation2 + $0x520] sm:$0xf0]  ;;  %v2778_v51 = vld [vmem:[#allocation2 + $0x5d8] sm:$0xf] }
 0x11f   :  { %1868 = vmatpush.bf16.msra.mxu3 %v2763_v25  ;;  %v979_v25 = vld [vmem:[%s3254_s5] sm:$0x7] }
 0x120   :  { %v980_v28 = vunpack.c.l.bf16 %v979_v25  ;;  %v2912_v25 = vld [vmem:[#allocation2 + $0x370] sm:$0xf0] }
 0x121   :  { %v850_v9 = vpop.f32.mrf.mxu2  ;;  %v863_v40 = vpop.f32.mrf.mxu3 }
 0x122   :  { %v851_v15 = vadd.f32 %v850_v9, %v838_v37  ;;  %v2982_v37 = vld [vmem:[#allocation2 + $0x5a4] sm:$0xf]  ;;  %v983_v32 = vperm.slane %v980_v28, 2 }
 0x123   :  { %v876_v26 = vpop.f32.mrf.mxu0  ;;  %v889_v27 = vpop.f32.mrf.mxu1  ;;  %v2751_v42 = vor.u32 %v2982_v37, %v2748_v38  ;;  %v1016_v37 = vperm.slane %v3202_v30, 1 }
 0x124   :  { %v3192_v24 = vadd.f32 %v863_v40, %v851_v15  ;;  %v877_v31 = vadd.f32 %v876_v26, %v298_v7  ;;  %v2712_v7 = vld [vmem:[#allocation2 + $0x564] sm:$0xf0]  ;;  %v2604_v15 = vld [vmem:[#allocation2 + $0x48c] sm:$0xf0] }
 0x125   :  { %1869 = vmatpush.bf16.msra.mxu3 %v2751_v42  ;;  %v2715_v9 = vor.u32 %v2973_v4, %v2712_v7  ;;  %v2607_v21 = vor.u32 %v2946_v14, %v2604_v15  ;;  %v2586_v4 = vld [vmem:[#allocation2 + $0x458] sm:$0xf]  ;;  %v2478_v15 = vld [vmem:[#allocation2 + $0x380] sm:$0xf] }
 0x126   :  { %v890_v39 = vadd.f32 %v889_v27, %v877_v31  ;;  %v971_v17 = vmax.f32 %v3192_v24, 0.0  ;;  %v982_v31 = vperm.slane %v980_v28, 0 }
 0x127   :  { %1860 = vmatpush.bf16.msra.mxu2 %v2607_v21 }
 0x128   :  { %v988_v41 = vperm.slane %v982_v31, 0  ;;  %v2790_v31 = vld [vmem:[#allocation2 + $0x5f0] sm:$0xf] }
 0x129   :  { %v852_v44 = vpop.f32.mrf.mxu2  ;;  %v865_v45 = vpop.f32.mrf.mxu3  ;;  %1870 = vmatpush.bf16.msra.mxu3 %v2739_v50 }
 0x12a   :  { %v989_v45 = vperm.slane %v983_v32, 0  ;;  %v2993_v32 = vld [vmem:[#allocation2 + $0x5f8] sm:$0xf0] }
 0x12b   :  { %v878_v58 = vpop.f32.mrf.mxu0  ;;  %v891_v59 = vpop.f32.mrf.mxu1 }
 0x12d   :  { %1871 = vmatpush.bf16.msra.mxu3 %v2727_v0  ;;  %v2490_v0 = vld [vmem:[#allocation2 + $0x398] sm:$0xf] }
 0x131   :  { %v902_v13 = vpop.f32.mrf.mxu2  ;;  %v915_v1 = vpop.f32.mrf.mxu3  ;;  %1872 = vmatpush.bf16.msra.mxu3 %v2715_v9  ;;  %v1018_v9 = vperm.slane %v3202_v30, 3  ;;  %v2969_v30 = vld [vmem:[#allocation2 + $0x538] sm:$0xf0] }
 0x132   :  { %v903_v5 = vadd.f32 %v902_v13, %v890_v39  ;;  %v984_v39 = vperm.slane %v980_v28, 4  ;;  %v2562_v28 = vld [vmem:[#allocation2 + $0x428] sm:$0xf] }
 0x134   :  { %v916_v40 = vadd.f32 %v915_v1, %v903_v5  ;;  %v990_v57 = vperm.slane %v984_v39, 0  ;;  %v2942_v5 = vld [vmem:[#allocation2 + $0x460] sm:$0xf0] }
 0x135   :  { %1873 = vmatpush.bf16.msra.mxu3 %v2703_v43  ;;  %v2479_v43 = vor.u32 %v2915_v16, %v2478_v15  ;;  %v2418_v16 = vld [vmem:[#allocation2 + $0x308] sm:$0xf] }
 0x136   :  { %v928_v10 = vpop.f32.mrf.mxu0  ;;  %v941_v11 = vpop.f32.mrf.mxu1  ;;  %v972_v18 = vmax.f32 %v916_v40, 0.0  ;;  %v2491_v40 = vor.u32 %v2918_v3, %v2490_v0  ;;  %v2430_v3 = vld [vmem:[#allocation2 + $0x320] sm:$0xf] }
 0x137   :  { %v929_v19 = vadd.f32 %v928_v10, %v299_v6  ;;  %v2587_v10 = vor.u32 %v2942_v5, %v2586_v4  ;;  %v2903_v4 = vld [vmem:[#allocation2 + $0x328] sm:$0xf0] }
 0x138   :  { %v974_v22 = vpack.c.bf16 %v972_v18, %v971_v17  ;;  %v2574_v17 = vld [vmem:[#allocation2 + $0x440] sm:$0xf]  ;;  %v2939_v18 = vld [vmem:[#allocation2 + $0x448] sm:$0xf0] }
 0x139   :  { %v942_v23 = vadd.f32 %v941_v11, %v929_v19  ;;  %v904_v26 = vpop.f32.mrf.mxu2  ;;  %v917_v27 = vpop.f32.mrf.mxu3 }
 0x13a   :  { %v976_v38 = vunpack.c.l.bf16 %v974_v22  ;;  %v977_v42 = vunpack.c.h.bf16 %v974_v22  ;;  %v2575_v22 = vor.u32 %v2939_v18, %v2574_v17  ;;  %v2900_v17 = vld [vmem:[#allocation2 + $0x310] sm:$0xf0] }
 0x13c   :  { %v991_v49 = vmul.f32 %v988_v41, %v976_v38  ;;  %v992_v60 = vmul.f32 %v989_v45, %v977_v42  ;;  %v2909_v38 = vld [vmem:[#allocation2 + $0x358] sm:$0xf0]  ;;  %v2550_v45 = vld [vmem:[#allocation2 + $0x410] sm:$0xf] }
 0x13e   :  { %v930_v29 = vpop.f32.mrf.mxu0  ;;  %v943_v24 = vpop.f32.mrf.mxu1  ;;  %v994_v7 = vadd.f32 %v992_v60, %v991_v49  ;;  %v2906_v49 = vld [vmem:[#allocation2 + $0x340] sm:$0xf0] }
 0x13f   :  { %v2936_v29 = vld [vmem:[#allocation2 + $0x430] sm:$0xf0]  ;;  %v2694_v24 = vld [vmem:[#allocation2 + $0x530] sm:$0xf]  ;;  %v2930_v60 = vld [vmem:[#allocation2 + $0x400] sm:$0xf0] }
 0x140   :  { %v2695_v42 = vor.u32 %v2969_v30, %v2694_v24  ;;  %v2634_v30 = vld [vmem:[#allocation2 + $0x4b8] sm:$0xf] }
 0x141   :  { %v954_v33 = vpop.f32.mrf.mxu2  ;;  %v967_v34 = vpop.f32.mrf.mxu3 }
 0x142   :  { %v955_v35 = vadd.f32 %v954_v33, %v942_v23  ;;  %v2466_v23 = vld [vmem:[#allocation2 + $0x368] sm:$0xf] }
 0x144   :  { %v968_v44 = vadd.f32 %v967_v34, %v955_v35  ;;  %v2467_v35 = vor.u32 %v2912_v25, %v2466_v23  ;;  %v2957_v23 = vld [vmem:[#allocation2 + $0x4d8] sm:$0xf0]  ;;  %v2742_v25 = vld [vmem:[#allocation2 + $0x590] sm:$0xf] }
 0x146   :  { %v1074_v46 = vpop.f32.mrf.mxu0  ;;  %v1087_v47 = vpop.f32.mrf.mxu1  ;;  %v973_v52 = vmax.f32 %v968_v44, 0.0  ;;  %v2791_v44 = vor.u32 %v2993_v32, %v2790_v31  ;;  %v2954_v31 = vld [vmem:[#allocation2 + $0x4c0] sm:$0xf0]  ;;  %v2730_v32 = vld [vmem:[#allocation2 + $0x578] sm:$0xf] }
 0x147   :  { %v1075_v53 = vadd.f32 %v1074_v46, %v1015_v36  ;;  %v1088_v54 = vadd.f32 %v1087_v47, %v1016_v37  ;;  %v2563_v36 = vor.u32 %v2936_v29, %v2562_v28  ;;  %v2454_v37 = vld [vmem:[#allocation2 + $0x350] sm:$0xf]  ;;  %v2933_v46 = vld [vmem:[#allocation2 + $0x418] sm:$0xf0]  ;;  %v2682_v47 = vld [vmem:[#allocation2 + $0x518] sm:$0xf] }
 0x148   :  { %v975_v50 = vpack.c.bf16 %v973_v52, %v973_v52  ;;  %v2990_v52 = vld [vmem:[#allocation2 + $0x5e0] sm:$0xf0]  ;;  %v2455_v55 = vor.u32 %v2909_v38, %v2454_v37  ;;  %v2551_v56 = vor.u32 %v2933_v46, %v2550_v45  ;;  %v2951_v37 = vld [vmem:[#allocation2 + $0x4a8] sm:$0xf0]  ;;  %v2718_v38 = vld [vmem:[#allocation2 + $0x560] sm:$0xf] }
 0x149   :  { %v1117_v58 = vmax.f32 %v1075_v53, 0.0  ;;  %v1118_v59 = vmax.f32 %v1088_v54, 0.0  ;;  %v956_v61 = vpop.f32.mrf.mxu2  ;;  %v969_v62 = vpop.f32.mrf.mxu3  ;;  %v2610_v46 = vld [vmem:[#allocation2 + $0x488] sm:$0xf] }
 0x14a   :  { %v978_v13 = vunpack.c.l.bf16 %v975_v50  ;;  %v2683_v50 = vor.u32 %v2966_v48, %v2682_v47  ;;  %v2670_v61 = vld [vmem:[#allocation2 + $0x500] sm:$0xf]  ;;  %v2963_v62 = vld [vmem:[#allocation2 + $0x508] sm:$0xf0]  ;;  %v2948_v47 = vld [vmem:[#allocation2 + $0x490] sm:$0xf0] }
 0x14b   :  { %v3206_v1 = vpack.c.bf16 %v1117_v58, %v1117_v58  ;;  %v3208_v2 = vpack.c.bf16 %v1118_v59, %v1118_v59  ;;  %v2779_v58 = vor.u32 %v2990_v52, %v2778_v51  ;;  %v2538_v59 = vld [vmem:[#allocation2 + $0x3f8] sm:$0xf]  ;;  %v2671_v5 = vor.u32 %v2963_v62, %v2670_v61  ;;  %v2706_v48 = vld [vmem:[#allocation2 + $0x548] sm:$0xf]  ;;  %v2972_v51 = vld [vmem:[#allocation2 + $0x550] sm:$0xf0] }
 0x14c   :  { %v993_v6 = vmul.f32 %v990_v57, %v978_v13  ;;  %v2442_v57 = vld [vmem:[#allocation2 + $0x338] sm:$0xf]  ;;  %v2539_v13 = vor.u32 %v2930_v60, %v2538_v59  ;;  %v2611_v52 = vor.u32 %v2948_v47, %v2610_v46  ;;  %v2407_v60 = vld [vmem:[%s3253_s4 + $0x3] sm:$0x7] }
 0x14d   :  { %1783 = vmatmul.bf16.vlgmr.msrb.gmra.mxu0 %v3206_v1  ;;  %1796 = vmatmul.bf16.vlgmr.msrb.gmra.mxu1 %v3208_v2  ;;  %v2443_v0 = vor.u32 %v2906_v49, %v2442_v57 }
 0x14e   :  { %1879 = vmatpush.bf16.msrb.mxu0 %v2503_v63  ;;  %1892 = vmatpush.bf16.msrb.mxu1 %v2599_v12  ;;  %v1076_v11 = vpop.f32.mrf.mxu0  ;;  %v1089_v14 = vpop.f32.mrf.mxu1  ;;  %v3214_v19 = vadd.f32 %v994_v7, %v993_v6  ;;  %v2766_v63 = vld [vmem:[#allocation2 + $0x5c0] sm:$0xf]  ;;  %v2987_v12 = vld [vmem:[#allocation2 + $0x5c8] sm:$0xf0] }
 0x14f   :  { %v2767_v6 = vor.u32 %v2987_v12, %v2766_v63  ;;  %v2526_v7 = vld [vmem:[#allocation2 + $0x3e0] sm:$0xf]  ;;  %v2984_v11 = vld [vmem:[#allocation2 + $0x5b0] sm:$0xf0]  ;;  %v2431_v14 = vor.u32 %v2903_v4, %v2430_v3  ;;  %v1257_v63 = vperm.slane %v2407_v60, 0 }
 0x151   :  { %v1100_v20 = vpop.f32.mrf.mxu2  ;;  %v1113_v21 = vpop.f32.mrf.mxu3 }
 0x152   :  { %1880 = vmatpush.bf16.msrb.mxu0 %v2491_v40  ;;  %1893 = vmatpush.bf16.msrb.mxu1 %v2587_v10  ;;  %v1101_v26 = vadd.f32 %v1100_v20, %v1017_v8  ;;  %v1114_v27 = vadd.f32 %v1113_v21, %v1018_v9  ;;  %v2927_v8 = vld [vmem:[#allocation2 + $0x3e8] sm:$0xf0]  ;;  %v2658_v9 = vld [vmem:[#allocation2 + $0x4e8] sm:$0xf]  ;;  %v2960_v40 = vld [vmem:[#allocation2 + $0x4f0] sm:$0xf0] }
 0x153   :  { %v2754_v10 = vld [vmem:[#allocation2 + $0x5a8] sm:$0xf]  ;;  %v2527_v15 = vor.u32 %v2927_v8, %v2526_v7  ;;  %v2659_v18 = vor.u32 %v2960_v40, %v2658_v9 }
 0x154   :  { %v1119_v33 = vmax.f32 %v1101_v26, 0.0  ;;  %v1120_v34 = vmax.f32 %v1114_v27, 0.0  ;;  %v2755_v20 = vor.u32 %v2984_v11, %v2754_v10  ;;  %v2514_v21 = vld [vmem:[#allocation2 + $0x3c8] sm:$0xf]  ;;  %v2981_v26 = vld [vmem:[#allocation2 + $0x598] sm:$0xf0]  ;;  %v2419_v27 = vor.u32 %v2900_v17, %v2418_v16 }
 0x155   :  { %v2743_v24 = vor.u32 %v2981_v26, %v2742_v25  ;;  %v1259_v10 = vperm.slane %v2407_v60, 2  ;;  %v2792_v16 = vld [vmem:[%s3254_s5 + $0x3] sm:$0x7] }
 0x156   :  { %1881 = vmatpush.bf16.msrb.mxu0 %v2479_v43  ;;  %1894 = vmatpush.bf16.msrb.mxu1 %v2575_v22  ;;  %v3216_v39 = vpack.c.bf16 %v1119_v33, %v1119_v33  ;;  %v3218_v41 = vpack.c.bf16 %v1120_v34, %v1120_v34  ;;  %v2924_v43 = vld [vmem:[#allocation2 + $0x3d0] sm:$0xf0]  ;;  %v2646_v22 = vld [vmem:[#allocation2 + $0x4d0] sm:$0xf]  ;;  %v2978_v33 = vld [vmem:[#allocation2 + $0x580] sm:$0xf0]  ;;  %v2635_v34 = vor.u32 %v2954_v31, %v2634_v30 }
 0x157   :  { %v2515_v28 = vor.u32 %v2924_v43, %v2514_v21  ;;  %v2647_v29 = vor.u32 %v2957_v23, %v2646_v22 }
 0x158   :  { %1809 = vmatmul.bf16.vlgmr.msrb.gmra.mxu2 %v3216_v39  ;;  %1822 = vmatmul.bf16.vlgmr.msrb.gmra.mxu3 %v3218_v41 }
 0x159   :  { %v1102_v53 = vpop.f32.mrf.mxu2  ;;  %v1115_v54 = vpop.f32.mrf.mxu3  ;;  %1905 = vmatpush.bf16.msrb.mxu2 %v2695_v42  ;;  %1918 = vmatpush.bf16.msrb.mxu3 %v2791_v44  ;;  %v2975_v42 = vld [vmem:[#allocation2 + $0x568] sm:$0xf0] }
 0x15a   :  { %1882 = vmatpush.bf16.msrb.mxu0 %v2467_v35  ;;  %1895 = vmatpush.bf16.msrb.mxu1 %v2563_v36  ;;  %v2731_v35 = vor.u32 %v2978_v33, %v2730_v32  ;;  %v2622_v36 = vld [vmem:[#allocation2 + $0x4a0] sm:$0xf]  ;;  %v2719_v45 = vor.u32 %v2975_v42, %v2718_v38  ;;  %v2707_v53 = vor.u32 %v2972_v51, %v2706_v48 }
 0x15b   :  { %v2623_v44 = vor.u32 %v2951_v37, %v2622_v36 }
 0x15d   :  { %1835 = vmatmul.bf16.vlgmr.msra.gmra.mxu0 %v3206_v1  ;;  %1848 = vmatmul.bf16.vlgmr.msra.gmra.mxu1 %v3208_v2 }
 0x15e   :  { %1883 = vmatpush.bf16.msrb.mxu0 %v2455_v55  ;;  %1896 = vmatpush.bf16.msrb.mxu1 %v2551_v56 }
 0x15f   :  { %1906 = vmatpush.bf16.msrb.mxu2 %v2683_v50  ;;  %1919 = vmatpush.bf16.msrb.mxu3 %v2779_v58 }
 0x162   :  { %1884 = vmatpush.bf16.msrb.mxu0 %v2443_v0  ;;  %1897 = vmatpush.bf16.msrb.mxu1 %v2539_v13 }
 0x163   :  { %1907 = vmatpush.bf16.msrb.mxu2 %v2671_v5  ;;  %1920 = vmatpush.bf16.msrb.mxu3 %v2767_v6 }
 0x166   :  { %1885 = vmatpush.bf16.msrb.mxu0 %v2431_v14  ;;  %1898 = vmatpush.bf16.msrb.mxu1 %v2527_v15 }
 0x167   :  { %1908 = vmatpush.bf16.msrb.mxu2 %v2659_v18  ;;  %1921 = vmatpush.bf16.msrb.mxu3 %v2755_v20  ;;  %v1941_v18 = vunpack.c.l.bf16 %v2792_v16 }
 0x168   :  { %1861 = vmatmul.bf16.vlgmr.msra.gmra.mxu2 %v3216_v39  ;;  %1874 = vmatmul.bf16.vlgmr.msra.gmra.mxu3 %v3218_v41 }
 0x169   :  { %v1943_v22 = vperm.slane %v1941_v18, 0  ;;  %v1944_v23 = vperm.slane %v1941_v18, 2 }
 0x16a   :  { %1886 = vmatpush.bf16.msrb.mxu0 %v2419_v27  ;;  %1899 = vmatpush.bf16.msrb.mxu1 %v2515_v28 }
 0x16b   :  { %1909 = vmatpush.bf16.msrb.mxu2 %v2647_v29  ;;  %1922 = vmatpush.bf16.msrb.mxu3 %v2743_v24  ;;  %v1949_v24 = vperm.slane %v1943_v22, 0  ;;  %v1950_v30 = vperm.slane %v1944_v23, 0 }
 0x16d   :  { %1887 = vmatmul.bf16.vlgmr.msrb.gmra.mxu0 %v3206_v1  ;;  %1900 = vmatmul.bf16.vlgmr.msrb.gmra.mxu1 %v3208_v2 }
 0x16f   :  { %1910 = vmatpush.bf16.msrb.mxu2 %v2635_v34  ;;  %1923 = vmatpush.bf16.msrb.mxu3 %v2731_v35  ;;  %v1945_v34 = vperm.slane %v1941_v18, 4 }
 0x171   :  { %v1951_v37 = vperm.slane %v1945_v34, 0 }
 0x173   :  { %1911 = vmatpush.bf16.msrb.mxu2 %v2623_v44  ;;  %1924 = vmatpush.bf16.msrb.mxu3 %v2719_v45 }
 0x177   :  { %1912 = vmatpush.bf16.msrb.mxu2 %v2611_v52  ;;  %1925 = vmatpush.bf16.msrb.mxu3 %v2707_v53  ;;  %v2998_v52 = vld [vmem:[%s3255_s6 + $0x1] ss:$0 sm:$0xff] }
 0x17a   :  { %1913 = vmatmul.bf16.vlgmr.msrb.gmra.mxu2 %v3216_v39  ;;  %1926 = vmatmul.bf16.vlgmr.msrb.gmra.mxu3 %v3218_v41  ;;  %v1258_v39 = vperm.slane %v2407_v60, 1 }
 0x1ca   :  { %v1784_v1 = vpop.f32.mrf.mxu0  ;;  %v1797_v2 = vpop.f32.mrf.mxu1 }
 0x1cb   :  { %v1785_v12 = vadd.f32 %v1784_v1, %v1257_v63 }
 0x1cd   :  { %v1798_v5 = vadd.f32 %v1797_v2, %v1785_v12  ;;  %v2999_v2 = vld [vmem:[%s3255_s6] ss:$0 sm:$0xff] }
 0x1d2   :  { %v1786_v54 = vpop.f32.mrf.mxu0  ;;  %v1799_v55 = vpop.f32.mrf.mxu1 }
 0x1da   :  { %v1836_v56 = vpop.f32.mrf.mxu0  ;;  %v1849_v57 = vpop.f32.mrf.mxu1 }
 0x1db   :  { %v1810_v49 = vpop.f32.mrf.mxu2  ;;  %v1823_v50 = vpop.f32.mrf.mxu3  ;;  %v1837_v41 = vadd.f32 %v1836_v56, %v1258_v39 }
 0x1dc   :  { %v1811_v8 = vadd.f32 %v1810_v49, %v1798_v5 }
 0x1dd   :  { %v1850_v6 = vadd.f32 %v1849_v57, %v1837_v41 }
 0x1de   :  { %v1824_v17 = vadd.f32 %v1823_v50, %v1811_v8 }
 0x1e0   :  { %v1931_v43 = vmax.f32 %v1824_v17, 0.0 }
 0x1e2   :  { %v1838_v58 = vpop.f32.mrf.mxu0  ;;  %v1851_v59 = vpop.f32.mrf.mxu1 }
 0x1e3   :  { %v1812_v61 = vpop.f32.mrf.mxu2  ;;  %v1825_v62 = vpop.f32.mrf.mxu3 }
 0x1ea   :  { %v1888_v0 = vpop.f32.mrf.mxu0  ;;  %v1901_v13 = vpop.f32.mrf.mxu1 }
 0x1eb   :  { %v1862_v3 = vpop.f32.mrf.mxu2  ;;  %v1875_v4 = vpop.f32.mrf.mxu3  ;;  %v1889_v20 = vadd.f32 %v1888_v0, %v1259_v10 }
 0x1ec   :  { %v1863_v7 = vadd.f32 %v1862_v3, %v1850_v6 }
 0x1ed   :  { %v1902_v25 = vadd.f32 %v1901_v13, %v1889_v20 }
 0x1ee   :  { %v1876_v11 = vadd.f32 %v1875_v4, %v1863_v7 }
 0x1f0   :  { %v1932_v21 = vmax.f32 %v1876_v11, 0.0 }
 0x1f2   :  { %v1890_v9 = vpop.f32.mrf.mxu0  ;;  %v1903_v40 = vpop.f32.mrf.mxu1  ;;  %v1934_v26 = vpack.c.bf16 %v1932_v21, %v1931_v43 }
 0x1f3   :  { %v1864_v14 = vpop.f32.mrf.mxu2  ;;  %v1877_v15 = vpop.f32.mrf.mxu3 }
 0x1f4   :  { %v1936_v31 = vunpack.c.l.bf16 %v1934_v26  ;;  %v1937_v32 = vunpack.c.h.bf16 %v1934_v26 }
 0x1f6   :  { %v1952_v38 = vmul.f32 %v1949_v24, %v1936_v31  ;;  %v1953_v42 = vmul.f32 %v1950_v30, %v1937_v32 }
 0x1f8   :  { %v1955_v48 = vadd.f32 %v1953_v42, %v1952_v38 }
 0x1fd   :  { %v1914_v27 = vpop.f32.mrf.mxu2  ;;  %v1927_v28 = vpop.f32.mrf.mxu3 }
 0x1fe   :  { %v1915_v29 = vadd.f32 %v1914_v27, %v1902_v25 }
 0x200   :  { %v1928_v33 = vadd.f32 %v1927_v28, %v1915_v29 }
 0x202   :  { %v1933_v35 = vmax.f32 %v1928_v33, 0.0 }
 0x204   :  { %v1935_v36 = vpack.c.bf16 %v1933_v35, %v1933_v35 }
 0x205   :  { %v1916_v44 = vpop.f32.mrf.mxu2  ;;  %v1929_v45 = vpop.f32.mrf.mxu3 }
 0x206   :  { %v1938_v46 = vunpack.c.l.bf16 %v1935_v36 }
 0x208   :  { %v1954_v47 = vmul.f32 %v1951_v37, %v1938_v46 }
 0x20a   :  { %v1956_v51 = vadd.f32 %v1955_v48, %v1954_v47 }
 0x20c   :  { %1957 = vadd.xlane.f32.xlu0 %v1956_v51 }
 0x214   :  { %996 = vadd.xlane.f32.xlu0 %v3214_v19 }
 0x27f   :  { %v1958_v53 = vpop.xlane.xlu0 %1957 }
 0x280   :  { %v1964_v1 = vadd.f32 %v2998_v52, %v1958_v53 }
 0x282   :  { %1966 = vrot.lane.b32.xlu1 %v1964_v1, %s3029_s10 }
 0x287   :  { %v997_v54 = vpop.xlane.xlu0 %996 }
 0x288   :  { %v1002_v55 = vadd.f32 %v2999_v2, %v997_v54 }
 0x28a   :  { %1004 = vst.msk [vmem:[%s3256_s7] sm:$0xff] %vm1003_vm2, %v1002_v55 }
 0x2f4   :  { %v1967_v19 = vpop.permute.xlu1 %1966 }
 0x2f5   :  { %1970 = vst.msk [vmem:[%s3256_s7] sm:$0xff] %vm1969_vm3, %v1967_v19 }
 0x2f6   :  { %1975 = vsyncpa [#allocation3], 1 }

</bundles_post_ra>
